<compile_context>
chip_gen: v6e
topology: v6e:2x2x1
jax: 0.10.0
libtpu: 0.0.40
codegen_flags: <defaults>
</compile_context>

<pallas_src>
import functools

import jax
import jax.numpy as jnp
from jax import lax
from jax.experimental import pallas as pl
from jax.experimental.pallas import tpu as pltpu

EPS = 1e-5


# --------------------------- Pallas kernels ---------------------------------

def _ch_reduce_kernel(x_ref, w_ref, b_ref, o_ref, *, H, W, WP):
    # x_ref: (1, 1, Cin, H*W) dense plane; o_ref: (1, 1, Cout, Hp*Wp) padded-plane layout.
    y = jnp.dot(w_ref[...], x_ref[0, 0], preferred_element_type=jnp.float32) + b_ref[...]
    o_ref[...] = jnp.zeros_like(o_ref)                      # zero H/W border
    for h in range(H):
        o_ref[0, 0, :, pl.ds((h + 1) * WP + 1, W)] = y[:, h * W:(h + 1) * W].astype(o_ref.dtype)


def _conv3d_kernel(x0_ref, x1_ref, x2_ref, w_ref, b_ref, scale_ref, shift_ref,
                   mask_ref, o_ref, stats_ref, xs_ref, *, H, W, WP,
                   apply_bn_relu, padded_out):
    # x{0,1,2}_ref: (1, 1, Cin, Hp*Wp) padded-plane depth taps d-1, d, d+1 (depth-clamped views)
    # w_ref: (9, Cout, 3*Cin) rows kd-major over channels   b_ref: (Cout, 1)
    # scale/shift_ref: (Cin, 1)  mask_ref: (1, Hp*Wp) interior mask
    # o_ref: (1, 1, Cout, Hp*Wp or H*W)  stats_ref: (Cout, 2) resident [sum, sumsq] accumulator
    # xs_ref: VMEM scratch (3*Cin, Hp*Wp)
    d = pl.program_id(1)
    n_d = pl.num_programs(1)
    cin = x0_ref.shape[2]
    cout = o_ref.shape[2]
    plane_len = (H - 1) * WP + W

    @pl.when(jnp.logical_and(pl.program_id(0) == 0, d == 0))
    def _init_stats():
        stats_ref[...] = jnp.zeros_like(stats_ref)

    # Stage the three depth taps into one (3*Cin, Hp*Wp) slab -> fat-K matmuls below.
    for k, xref in enumerate((x0_ref, x1_ref, x2_ref)):
        p = xref[0, 0]                                      # (Cin, Hp*Wp)
        if apply_bn_relu:
            # fused BatchNorm1-normalize + ReLU of the previous conv's raw output
            p = jnp.maximum(p * scale_ref[...] + shift_ref[...], 0.0)
            p = p * mask_ref[...]                           # restore zero H/W border
        if k != 1:
            # depth "same" padding handled in-kernel: zero out-of-range (clamped) taps
            pd = d - 1 + k
            valid = jnp.logical_and(pd >= 0, pd < n_d)
            p = p * jnp.where(valid, 1.0, 0.0)
        xs_ref[pl.ds(k * cin, cin), :] = p

    # 9 taps (kh, kw), each a single MXU matmul with contraction K = 3*Cin (offset trick).
    acc = jnp.zeros((cout, plane_len), jnp.float32)
    for kh in range(3):
        for kw in range(3):
            off = kh * WP + kw
            patch = xs_ref[:, pl.ds(off, plane_len)]        # (3*Cin, plane_len)
            acc = acc + jnp.dot(w_ref[kh * 3 + kw], patch,
                                preferred_element_type=jnp.float32)
    acc = acc + b_ref[...]

    # Fused BatchNorm batch statistics over the valid output positions only.
    # The interior mask shifted by (WP + 1) is exactly the column-validity mask of `acc`.
    vmask = mask_ref[:, pl.ds(WP + 1, plane_len)]           # (1, plane_len), 0/1
    accm = acc * vmask
    stats_ref[:, 0:1] += jnp.sum(accm, axis=1, keepdims=True)
    stats_ref[:, 1:2] += jnp.sum(accm * acc, axis=1, keepdims=True)

    # Write the valid rows: padded-plane layout (next conv consumes directly) or dense layout.
    if padded_out:
        o_ref[...] = jnp.zeros_like(o_ref)
        for h in range(H):
            o_ref[0, 0, :, pl.ds((h + 1) * WP + 1, W)] = (
                acc[:, h * WP:h * WP + W].astype(o_ref.dtype))
    else:
        for h in range(H):
            o_ref[0, 0, :, pl.ds(h * W, W)] = acc[:, h * WP:h * WP + W].astype(o_ref.dtype)


def _epilogue_rescale_kernel(h_ref, x_ref, scale_ref, shift_ref,
                             wi_ref, bi_ref, wr_ref, br_ref, o_ref):
    # BN2-normalize + ReLU + ch_increase + rescaling 1x1x1 conv + residual add.
    h = jnp.maximum(h_ref[0, 0] * scale_ref[...] + shift_ref[...], 0.0)
    y = jnp.dot(wi_ref[...], h, preferred_element_type=jnp.float32) + bi_ref[...]
    y = y + jnp.dot(wr_ref[...], x_ref[0, 0], preferred_element_type=jnp.float32) + br_ref[...]
    o_ref[0, 0] = y.astype(o_ref.dtype)


def _epilogue_identity_kernel(h_ref, x_ref, scale_ref, shift_ref, wi_ref, bi_ref, o_ref):
    # BN2-normalize + ReLU + ch_increase + identity skip (in_ch == out_ch).
    h = jnp.maximum(h_ref[0, 0] * scale_ref[...] + shift_ref[...], 0.0)
    y = jnp.dot(wi_ref[...], h, preferred_element_type=jnp.float32) + bi_ref[...]
    o_ref[0, 0] = (y + x_ref[0, 0]).astype(o_ref.dtype)


# --------------------------- wrappers ----------------------------------------

def ch_reduce_padded(x, w, b, spatial):
    # x: (N, D, Cin, H*W) dense -> (N, D, Cout, Hp*Wp) padded-plane layout (zero borders).
    n, dd, cin, hw = x.shape
    sh, sw = spatial
    assert hw == sh * sw
    cout = w.shape[0]
    hp, wp_ = sh + 2, sw + 2
    kern = functools.partial(_ch_reduce_kernel, H=sh, W=sw, WP=wp_)
    return pl.pallas_call(
        kern,
        out_shape=jax.ShapeDtypeStruct((n, dd, cout, hp * wp_), x.dtype),
        grid=(n, dd),
        in_specs=[pl.BlockSpec((1, 1, cin, hw), lambda i, j: (i, j, 0, 0)),
                  pl.BlockSpec((cout, cin), lambda i, j: (0, 0)),
                  pl.BlockSpec((cout, 1), lambda i, j: (0, 0))],
        out_specs=pl.BlockSpec((1, 1, cout, hp * wp_), lambda i, j: (i, j, 0, 0)),
        compiler_params=pltpu.CompilerParams(dimension_semantics=("parallel", "parallel")),
    )(x, w, b)


def conv3d_same(xp, w, b, spatial, scale=None, shift=None, padded_out=False):
    # xp: (N, D, Cin, Hp*Wp) padded-plane layout -> conv output + fused per-channel BN stats.
    # Output is (N, D, Cout, Hp*Wp) padded-plane (padded_out) or (N, D, Cout, H*W) dense.
    n, dd, cin, hpwp = xp.shape
    sh, sw = spatial
    hp, wp_ = sh + 2, sw + 2
    assert hpwp == hp * wp_
    cout = w.shape[-1]
    apply_bn_relu = scale is not None
    if scale is None:
        scale = jnp.ones((cin, 1), jnp.float32)
        shift = jnp.zeros((cin, 1), jnp.float32)

    # Weights (kd, kh, kw, Cin, Cout) -> (9, Cout, 3*Cin) with rows kd-major over channels.
    wm = jnp.transpose(w, (1, 2, 0, 3, 4)).reshape(3, 3, 3 * cin, cout)
    wm = jnp.transpose(wm, (0, 1, 3, 2)).reshape(9, cout, 3 * cin)

    # Interior mask of a padded plane (1 inside, 0 on the H/W pad border).
    r = jnp.arange(hp)
    c = jnp.arange(wp_)
    mask = (((r >= 1) & (r <= sh))[:, None] & ((c >= 1) & (c <= sw))[None, :])
    mask = mask.astype(jnp.float32).reshape(1, hp * wp_)

    out_last = hp * wp_ if padded_out else sh * sw
    kern = functools.partial(_conv3d_kernel, H=sh, W=sw, WP=wp_,
                             apply_bn_relu=apply_bn_relu, padded_out=padded_out)

    # Depth taps d-1, d, d+1 via clamped index maps; out-of-range taps are zeroed in-kernel.
    tap0 = lambda i, j: (i, jnp.maximum(j - 1, 0), 0, 0)
    tap1 = lambda i, j: (i, j, 0, 0)
    tap2 = lambda i, j: (i, jnp.minimum(j + 1, dd - 1), 0, 0)

    out, stats = pl.pallas_call(
        kern,
        out_shape=(jax.ShapeDtypeStruct((n, dd, cout, out_last), xp.dtype),
                   jax.ShapeDtypeStruct((cout, 2), jnp.float32)),
        grid=(n, dd),
        in_specs=[pl.BlockSpec((1, 1, cin, hp * wp_), tap0),
                  pl.BlockSpec((1, 1, cin, hp * wp_), tap1),
                  pl.BlockSpec((1, 1, cin, hp * wp_), tap2),
                  pl.BlockSpec((9, cout, 3 * cin), lambda i, j: (0, 0, 0)),
                  pl.BlockSpec((cout, 1), lambda i, j: (0, 0)),
                  pl.BlockSpec((cin, 1), lambda i, j: (0, 0)),
                  pl.BlockSpec((cin, 1), lambda i, j: (0, 0)),
                  pl.BlockSpec((1, hp * wp_), lambda i, j: (0, 0))],
        out_specs=(pl.BlockSpec((1, 1, cout, out_last), lambda i, j: (i, j, 0, 0)),
                   pl.BlockSpec((cout, 2), lambda i, j: (0, 0))),
        scratch_shapes=[pltpu.VMEM((3 * cin, hp * wp_), jnp.float32)],
        # stats output is a resident accumulator across the whole grid -> axes must be arbitrary
        compiler_params=pltpu.CompilerParams(dimension_semantics=("arbitrary", "arbitrary")),
    )(xp, xp, xp, wm, b, scale, shift, mask)
    return out, stats


def bn_scale_shift(stats, gamma, beta, count):
    # Per-channel affine equivalent of training-mode BatchNorm (biased variance).
    mean = stats[:, 0:1] / count
    var = jnp.maximum(stats[:, 1:2] / count - mean * mean, 0.0)
    scale = gamma * lax.rsqrt(var + EPS)
    shift = beta - mean * scale
    return scale, shift


def residual_epilogue(h, x, scale, shift, wi, bi, wr, br):
    n, d, cmid, hw = h.shape
    cin = x.shape[2]
    cout = wi.shape[0]
    base_specs = [pl.BlockSpec((1, 1, cmid, hw), lambda i, j: (i, j, 0, 0)),
                  pl.BlockSpec((1, 1, cin, hw), lambda i, j: (i, j, 0, 0)),
                  pl.BlockSpec((cmid, 1), lambda i, j: (0, 0)),
                  pl.BlockSpec((cmid, 1), lambda i, j: (0, 0)),
                  pl.BlockSpec((cout, cmid), lambda i, j: (0, 0)),
                  pl.BlockSpec((cout, 1), lambda i, j: (0, 0))]
    out_spec = pl.BlockSpec((1, 1, cout, hw), lambda i, j: (i, j, 0, 0))
    cp = pltpu.CompilerParams(dimension_semantics=("parallel", "parallel"))
    out_shape = jax.ShapeDtypeStruct((n, d, cout, hw), h.dtype)
    if wr is not None:
        return pl.pallas_call(
            _epilogue_rescale_kernel, out_shape=out_shape, grid=(n, d),
            in_specs=base_specs + [pl.BlockSpec((cout, cin), lambda i, j: (0, 0)),
                                   pl.BlockSpec((cout, 1), lambda i, j: (0, 0))],
            out_specs=out_spec, compiler_params=cp,
        )(h, x, scale, shift, wi, bi, wr, br)
    return pl.pallas_call(
        _epilogue_identity_kernel, out_shape=out_shape, grid=(n, d),
        in_specs=base_specs, out_specs=out_spec, compiler_params=cp,
    )(h, x, scale, shift, wi, bi)


# --------------------------- module forward ----------------------------------

def conv_res_block_3d(x_ncdhw, p):
    """Forward pass of ConvResBlock3d. Input is PyTorch layout (N, C, D, H, W)."""
    n, cin, dd, hh, ww = x_ncdhw.shape
    hw = hh * ww
    count = float(n * dd * hw)
    xt = jnp.transpose(x_ncdhw, (0, 2, 1, 3, 4)).reshape(n, dd, cin, hw)   # depth-major dense

    # ch_reduce (1x1x1) -> padded-plane layout (no jnp.pad round trip)
    h0p = ch_reduce_padded(xt, p["w_red"], p["b_red"], (hh, ww))
    # conv1 (raw 3x3x3 conv) with fused BN1 stats, padded-plane output for conv2
    c1p, st1 = conv3d_same(h0p, p["w1"], p["b1"], (hh, ww), padded_out=True)
    sc1, sh1 = bn_scale_shift(st1, p["g1"], p["be1"], count)
    # conv2 with BN1-normalize + ReLU fused into its prologue and fused BN2 stats, dense output
    c2, st2 = conv3d_same(c1p, p["w2"], p["b2"], (hh, ww), scale=sc1, shift=sh1,
                          padded_out=False)
    sc2, sh2 = bn_scale_shift(st2, p["g2"], p["be2"], count)
    # fused epilogue: BN2-normalize + ReLU + ch_increase + rescale/identity + residual add
    out = residual_epilogue(c2, xt, sc2, sh2, p["w_inc"], p["b_inc"],
                            p["w_res"], p["b_res"])
    return jnp.transpose(out.reshape(n, dd, -1, hh, ww), (0, 2, 1, 3, 4))  # back to NCDHW


# --------------------------- params & reference -------------------------------

def init_params(key, in_ch, out_ch, k=3):
    mid_in, mid_out = in_ch // 2, out_ch // 2

    def conv_init(kk, cout, cin, kernel_shape=()):
        fan_in = cin
        for s in kernel_shape:
            fan_in *= s
        bound = 1.0 / (fan_in ** 0.5)
        kw_, kb_ = jax.random.split(kk)
        if kernel_shape:
            w = jax.random.uniform(kw_, kernel_shape + (cin, cout), jnp.float32, -bound, bound)
        else:
            w = jax.random.uniform(kw_, (cout, cin), jnp.float32, -bound, bound)
        b = jax.random.uniform(kb_, (cout, 1), jnp.float32, -bound, bound)
        return w, b

    ks = jax.random.split(key, 5)
    w_red, b_red = conv_init(ks[0], mid_in, in_ch)
    w1, b1 = conv_init(ks[1], mid_out, mid_in, (k, k, k))
    w2, b2 = conv_init(ks[2], mid_out, mid_out, (k, k, k))
    w_inc, b_inc = conv_init(ks[3], out_ch, mid_out)
    if in_ch == out_ch:
        w_res, b_res = None, None
    else:
        w_res, b_res = conv_init(ks[4], out_ch, in_ch)
    ones = lambda c: jnp.ones((c, 1), jnp.float32)
    zeros = lambda c: jnp.zeros((c, 1), jnp.float32)
    return dict(w_red=w_red, b_red=b_red,
                w1=w1, b1=b1, g1=ones(mid_out), be1=zeros(mid_out),
                w2=w2, b2=b2, g2=ones(mid_out), be2=zeros(mid_out),
                w_inc=w_inc, b_inc=b_inc, w_res=w_res, b_res=b_res)


def ref_forward(x_ncdhw, p):
    """Pure-JAX reference (no Pallas) for validation."""
    hi = lax.Precision.HIGHEST
    x = jnp.transpose(x_ncdhw, (0, 2, 3, 4, 1))  # NDHWC

    def pconv(t, w_oc_ic, b):
        return jnp.einsum("ndhwc,oc->ndhwo", t, w_oc_ic, precision=hi) + b.reshape(-1)

    def conv3(t, w, b):
        dn = lax.conv_dimension_numbers(t.shape, w.shape, ("NDHWC", "DHWIO", "NDHWC"))
        return lax.conv_general_dilated(t, w, (1, 1, 1), "SAME",
                                        dimension_numbers=dn, precision=hi) + b.reshape(-1)

    def bnrelu(t, g, b):
        mean = jnp.mean(t, axis=(0, 1, 2, 3), keepdims=True)
        var = jnp.mean((t - mean) ** 2, axis=(0, 1, 2, 3), keepdims=True)
        y = (t - mean) * lax.rsqrt(var + EPS) * g.reshape(-1) + b.reshape(-1)
        return jnp.maximum(y, 0.0)

    h = pconv(x, p["w_red"], p["b_red"])
    h = bnrelu(conv3(h, p["w1"], p["b1"]), p["g1"], p["be1"])
    h = bnrelu(conv3(h, p["w2"], p["b2"]), p["g2"], p["be2"])
    out = pconv(h, p["w_inc"], p["b_inc"])
    out = out + (x if p["w_res"] is None else pconv(x, p["w_res"], p["b_res"]))
    return jnp.transpose(out, (0, 4, 1, 2, 3))


# --------------------------- main ---------------------------------------------

if __name__ == "__main__":
    key = jax.random.PRNGKey(0)
    N, D, H, W = 2, 8, 8, 8

    for in_ch, out_ch in ((4, 8), (4, 4)):   # rescaling-conv path and identity-skip path
        kx, kp = jax.random.split(jax.random.fold_in(key, out_ch))
        x = jax.random.normal(kx, (N, in_ch, D, H, W), jnp.float32)
        params = init_params(kp, in_ch, out_ch)

        out = jax.block_until_ready(jax.jit(conv_res_block_3d)(x, params))
        assert out.shape == (N, out_ch, D, H, W), out.shape

        ref = ref_forward(x, params)
        rel_err = float(jnp.max(jnp.abs(out - ref)) / (jnp.max(jnp.abs(ref)) + 1e-6))
        if rel_err > 1e-2:
            raise AssertionError(
                f"Pallas output mismatch (in={in_ch}, out={out_ch}): rel_err={rel_err}")

    print("KERNEL_OK")
</pallas_src>

<mosaic_0001>
module attributes {stable_mosaic.version = 11 : i64} {
  func.func @_ch_reduce_kernel(%arg0: i32, %arg1: i32, %arg2: memref<1x1x4x64xf32, #tpu.memory_space<vmem>>, %arg3: memref<2x4xf32, #tpu.memory_space<vmem>>, %arg4: memref<2x1xf32, #tpu.memory_space<vmem>>, %arg5: memref<1x1x2x100xf32, #tpu.memory_space<vmem>>) attributes {dimension_semantics = [#tpu.dimension_semantics<parallel>, #tpu.dimension_semantics<parallel>], iteration_bounds = array<i64: 2, 8>, scalar_prefetch = 0 : i64, scratch_operands = 0 : i64, tpu.core_type = #tpu.core_type<tc>, window_params = [{transform_indices = @transform_0, window_bounds = array<i64: 1, 1, 4, 64>}, {pipeline_mode = #tpu.pipeline_mode<synchronous>, transform_indices = @transform_1, window_bounds = array<i64: 2, 4>}, {pipeline_mode = #tpu.pipeline_mode<synchronous>, transform_indices = @transform_2, window_bounds = array<i64: 2, 1>}, {transform_indices = @transform_3, window_bounds = array<i64: 1, 1, 2, 100>}]} {
    %c0 = arith.constant 0 : index
    %c0_0 = arith.constant 0 : index
    %0 = vector.load %arg3[%c0, %c0_0] : memref<2x4xf32, #tpu.memory_space<vmem>>, vector<2x4xf32>
    %c0_1 = arith.constant 0 : index
    %c0_2 = arith.constant 0 : index
    %c0_3 = arith.constant 0 : index
    %c0_4 = arith.constant 0 : index
    %1 = vector.load %arg2[%c0_1, %c0_2, %c0_3, %c0_4] : memref<1x1x4x64xf32, #tpu.memory_space<vmem>>, vector<1x1x4x64xf32>
    %2 = vector.shape_cast %1 : vector<1x1x4x64xf32> to vector<4x64xf32>
    %cst = arith.constant dense<0.000000e+00> : vector<2x64xf32>
    %3 = tpu.matmul %0, %2, %cst {dimension_numbers = #tpu.dot_dimension_numbers<[1], [0], [0], [1], [0, 0, 1, 1], [], []>} : vector<2x4xf32>, vector<4x64xf32>, vector<2x64xf32> -> vector<2x64xf32>
    %c0_5 = arith.constant 0 : index
    %c0_6 = arith.constant 0 : index
    %4 = vector.load %arg4[%c0_5, %c0_6] : memref<2x1xf32, #tpu.memory_space<vmem>>, vector<2x1xf32>
    %5 = vector.broadcast %4 : vector<2x1xf32> to vector<2x64xf32>
    %6 = arith.addf %3, %5 : vector<2x64xf32>
    %cst_7 = arith.constant 0.000000e+00 : f32
    %7 = vector.broadcast %cst_7 : f32 to vector<1x1x2x100xf32>
    %c0_8 = arith.constant 0 : index
    %c0_9 = arith.constant 0 : index
    %c0_10 = arith.constant 0 : index
    %c0_11 = arith.constant 0 : index
    %8 = vector.load %arg5[%c0_8, %c0_9, %c0_10, %c0_11] : memref<1x1x2x100xf32, #tpu.memory_space<vmem>>, vector<1x1x2x100xf32>
    tpu.vector_store %arg5[%c0_8, %c0_9, %c0_10, %c0_11], %7 {strides = array<i32>} : memref<1x1x2x100xf32, #tpu.memory_space<vmem>>, vector<1x1x2x100xf32>,
    %9 = vector.extract_strided_slice %6 {offsets = [0, 0], sizes = [2, 8], strides = [1, 1]} : vector<2x64xf32> to vector<2x8xf32>
    %c0_12 = arith.constant 0 : index
    %c0_13 = arith.constant 0 : index
    %c0_14 = arith.constant 0 : index
    %c11 = arith.constant 11 : index
    %10 = vector.load %arg5[%c0_12, %c0_13, %c0_14, %c11] : memref<1x1x2x100xf32, #tpu.memory_space<vmem>>, vector<1x1x2x8xf32>
    %11 = vector.shape_cast %10 : vector<1x1x2x8xf32> to vector<2x8xf32>
    %12 = vector.shape_cast %9 : vector<2x8xf32> to vector<1x1x2x8xf32>
    tpu.vector_store %arg5[%c0_12, %c0_13, %c0_14, %c11], %12 {strides = array<i32>} : memref<1x1x2x100xf32, #tpu.memory_space<vmem>>, vector<1x1x2x8xf32>,
    %13 = vector.extract_strided_slice %6 {offsets = [0, 8], sizes = [2, 8], strides = [1, 1]} : vector<2x64xf32> to vector<2x8xf32>
    %c0_15 = arith.constant 0 : index
    %c0_16 = arith.constant 0 : index
    %c0_17 = arith.constant 0 : index
    %c21 = arith.constant 21 : index
    %14 = vector.load %arg5[%c0_15, %c0_16, %c0_17, %c21] : memref<1x1x2x100xf32, #tpu.memory_space<vmem>>, vector<1x1x2x8xf32>
    %15 = vector.shape_cast %14 : vector<1x1x2x8xf32> to vector<2x8xf32>
    %16 = vector.shape_cast %13 : vector<2x8xf32> to vector<1x1x2x8xf32>
    tpu.vector_store %arg5[%c0_15, %c0_16, %c0_17, %c21], %16 {strides = array<i32>} : memref<1x1x2x100xf32, #tpu.memory_space<vmem>>, vector<1x1x2x8xf32>,
    %17 = vector.extract_strided_slice %6 {offsets = [0, 16], sizes = [2, 8], strides = [1, 1]} : vector<2x64xf32> to vector<2x8xf32>
    %c0_18 = arith.constant 0 : index
    %c0_19 = arith.constant 0 : index
    %c0_20 = arith.constant 0 : index
    %c31 = arith.constant 31 : index
    %18 = vector.load %arg5[%c0_18, %c0_19, %c0_20, %c31] : memref<1x1x2x100xf32, #tpu.memory_space<vmem>>, vector<1x1x2x8xf32>
    %19 = vector.shape_cast %18 : vector<1x1x2x8xf32> to vector<2x8xf32>
    %20 = vector.shape_cast %17 : vector<2x8xf32> to vector<1x1x2x8xf32>
    tpu.vector_store %arg5[%c0_18, %c0_19, %c0_20, %c31], %20 {strides = array<i32>} : memref<1x1x2x100xf32, #tpu.memory_space<vmem>>, vector<1x1x2x8xf32>,
    %21 = vector.extract_strided_slice %6 {offsets = [0, 24], sizes = [2, 8], strides = [1, 1]} : vector<2x64xf32> to vector<2x8xf32>
    %c0_21 = arith.constant 0 : index
    %c0_22 = arith.constant 0 : index
    %c0_23 = arith.constant 0 : index
    %c41 = arith.constant 41 : index
    %22 = vector.load %arg5[%c0_21, %c0_22, %c0_23, %c41] : memref<1x1x2x100xf32, #tpu.memory_space<vmem>>, vector<1x1x2x8xf32>
    %23 = vector.shape_cast %22 : vector<1x1x2x8xf32> to vector<2x8xf32>
    %24 = vector.shape_cast %21 : vector<2x8xf32> to vector<1x1x2x8xf32>
    tpu.vector_store %arg5[%c0_21, %c0_22, %c0_23, %c41], %24 {strides = array<i32>} : memref<1x1x2x100xf32, #tpu.memory_space<vmem>>, vector<1x1x2x8xf32>,
    %25 = vector.extract_strided_slice %6 {offsets = [0, 32], sizes = [2, 8], strides = [1, 1]} : vector<2x64xf32> to vector<2x8xf32>
    %c0_24 = arith.constant 0 : index
    %c0_25 = arith.constant 0 : index
    %c0_26 = arith.constant 0 : index
    %c51 = arith.constant 51 : index
    %26 = vector.load %arg5[%c0_24, %c0_25, %c0_26, %c51] : memref<1x1x2x100xf32, #tpu.memory_space<vmem>>, vector<1x1x2x8xf32>
    %27 = vector.shape_cast %26 : vector<1x1x2x8xf32> to vector<2x8xf32>
    %28 = vector.shape_cast %25 : vector<2x8xf32> to vector<1x1x2x8xf32>
    tpu.vector_store %arg5[%c0_24, %c0_25, %c0_26, %c51], %28 {strides = array<i32>} : memref<1x1x2x100xf32, #tpu.memory_space<vmem>>, vector<1x1x2x8xf32>,
    %29 = vector.extract_strided_slice %6 {offsets = [0, 40], sizes = [2, 8], strides = [1, 1]} : vector<2x64xf32> to vector<2x8xf32>
    %c0_27 = arith.constant 0 : index
    %c0_28 = arith.constant 0 : index
    %c0_29 = arith.constant 0 : index
    %c61 = arith.constant 61 : index
    %30 = vector.load %arg5[%c0_27, %c0_28, %c0_29, %c61] : memref<1x1x2x100xf32, #tpu.memory_space<vmem>>, vector<1x1x2x8xf32>
    %31 = vector.shape_cast %30 : vector<1x1x2x8xf32> to vector<2x8xf32>
    %32 = vector.shape_cast %29 : vector<2x8xf32> to vector<1x1x2x8xf32>
    tpu.vector_store %arg5[%c0_27, %c0_28, %c0_29, %c61], %32 {strides = array<i32>} : memref<1x1x2x100xf32, #tpu.memory_space<vmem>>, vector<1x1x2x8xf32>,
    %33 = vector.extract_strided_slice %6 {offsets = [0, 48], sizes = [2, 8], strides = [1, 1]} : vector<2x64xf32> to vector<2x8xf32>
    %c0_30 = arith.constant 0 : index
    %c0_31 = arith.constant 0 : index
    %c0_32 = arith.constant 0 : index
    %c71 = arith.constant 71 : index
    %34 = vector.load %arg5[%c0_30, %c0_31, %c0_32, %c71] : memref<1x1x2x100xf32, #tpu.memory_space<vmem>>, vector<1x1x2x8xf32>
    %35 = vector.shape_cast %34 : vector<1x1x2x8xf32> to vector<2x8xf32>
    %36 = vector.shape_cast %33 : vector<2x8xf32> to vector<1x1x2x8xf32>
    tpu.vector_store %arg5[%c0_30, %c0_31, %c0_32, %c71], %36 {strides = array<i32>} : memref<1x1x2x100xf32, #tpu.memory_space<vmem>>, vector<1x1x2x8xf32>,
    %37 = vector.extract_strided_slice %6 {offsets = [0, 56], sizes = [2, 8], strides = [1, 1]} : vector<2x64xf32> to vector<2x8xf32>
    %c0_33 = arith.constant 0 : index
    %c0_34 = arith.constant 0 : index
    %c0_35 = arith.constant 0 : index
    %c81 = arith.constant 81 : index
    %38 = vector.load %arg5[%c0_33, %c0_34, %c0_35, %c81] : memref<1x1x2x100xf32, #tpu.memory_space<vmem>>, vector<1x1x2x8xf32>
    %39 = vector.shape_cast %38 : vector<1x1x2x8xf32> to vector<2x8xf32>
    %40 = vector.shape_cast %37 : vector<2x8xf32> to vector<1x1x2x8xf32>
    tpu.vector_store %arg5[%c0_33, %c0_34, %c0_35, %c81], %40 {strides = array<i32>} : memref<1x1x2x100xf32, #tpu.memory_space<vmem>>, vector<1x1x2x8xf32>,
    return
  }
  func.func @transform_0(%arg0: i32, %arg1: i32) -> (i32, i32, i32, i32) {
    %c0_i32 = arith.constant 0 : i32
    %c0_i32_0 = arith.constant 0 : i32
    %c0_i32_1 = arith.constant 0 : i32
    return %arg0, %arg1, %c0_i32, %c0_i32_0 : i32, i32, i32, i32
  }
  func.func @transform_1(%arg0: i32, %arg1: i32) -> (i32, i32) {
    %c0_i32 = arith.constant 0 : i32
    %c0_i32_0 = arith.constant 0 : i32
    %c0_i32_1 = arith.constant 0 : i32
    return %c0_i32, %c0_i32_0 : i32, i32
  }
  func.func @transform_2(%arg0: i32, %arg1: i32) -> (i32, i32) {
    %c0_i32 = arith.constant 0 : i32
    %c0_i32_0 = arith.constant 0 : i32
    %c0_i32_1 = arith.constant 0 : i32
    return %c0_i32, %c0_i32_0 : i32, i32
  }
  func.func @transform_3(%arg0: i32, %arg1: i32) -> (i32, i32, i32, i32) {
    %c0_i32 = arith.constant 0 : i32
    %c0_i32_0 = arith.constant 0 : i32
    %c0_i32_1 = arith.constant 0 : i32
    return %arg0, %arg1, %c0_i32, %c0_i32_0 : i32, i32, i32, i32
  }
}

module attributes {stable_mosaic.version = 11 : i64} {
  func.func @_conv3d_kernel(%arg0: i32, %arg1: i32, %arg2: memref<1x1x2x100xf32, #tpu.memory_space<vmem>>, %arg3: memref<1x1x2x100xf32, #tpu.memory_space<vmem>>, %arg4: memref<1x1x2x100xf32, #tpu.memory_space<vmem>>, %arg5: memref<9x4x6xf32, #tpu.memory_space<vmem>>, %arg6: memref<4x1xf32, #tpu.memory_space<vmem>>, %arg7: memref<2x1xf32, #tpu.memory_space<vmem>>, %arg8: memref<2x1xf32, #tpu.memory_space<vmem>>, %arg9: memref<1x100xf32, #tpu.memory_space<vmem>>, %arg10: memref<1x1x4x100xf32, #tpu.memory_space<vmem>>, %arg11: memref<4x2xf32, #tpu.memory_space<vmem>>, %arg12: memref<6x100xf32, #tpu.memory_space<vmem>>) attributes {dimension_semantics = [#tpu.dimension_semantics<arbitrary>, #tpu.dimension_semantics<arbitrary>], iteration_bounds = array<i64: 2, 8>, scalar_prefetch = 0 : i64, scratch_operands = 1 : i64, tpu.core_type = #tpu.core_type<tc>, window_params = [{transform_indices = @transform_0, window_bounds = array<i64: 1, 1, 2, 100>}, {transform_indices = @transform_1, window_bounds = array<i64: 1, 1, 2, 100>}, {transform_indices = @transform_2, window_bounds = array<i64: 1, 1, 2, 100>}, {pipeline_mode = #tpu.pipeline_mode<synchronous>, transform_indices = @transform_3, window_bounds = array<i64: 9, 4, 6>}, {pipeline_mode = #tpu.pipeline_mode<synchronous>, transform_indices = @transform_4, window_bounds = array<i64: 4, 1>}, {pipeline_mode = #tpu.pipeline_mode<synchronous>, transform_indices = @transform_5, window_bounds = array<i64: 2, 1>}, {pipeline_mode = #tpu.pipeline_mode<synchronous>, transform_indices = @transform_6, window_bounds = array<i64: 2, 1>}, {pipeline_mode = #tpu.pipeline_mode<synchronous>, transform_indices = @transform_7, window_bounds = array<i64: 1, 100>}, {transform_indices = @transform_8, window_bounds = array<i64: 1, 1, 4, 100>}, {pipeline_mode = #tpu.pipeline_mode<synchronous>, transform_indices = @transform_9, window_bounds = array<i64: 4, 2>}]} {
    %c0_i32 = arith.constant 0 : i32
    %0 = arith.cmpi eq, %arg0, %c0_i32 : i32
    %c0_i32_0 = arith.constant 0 : i32
    %1 = arith.cmpi eq, %arg1, %c0_i32_0 : i32
    %2 = arith.andi %0, %1 : i1
    %3 = arith.extui %2 : i1 to i32
    %c0_i32_1 = arith.constant 0 : i32
    %4 = arith.cmpi ne, %3, %c0_i32_1 : i32
    scf.if %4 {
      %cst_113 = arith.constant 0.000000e+00 : f32
      %127 = vector.broadcast %cst_113 : f32 to vector<4x2xf32>
      %c0_114 = arith.constant 0 : index
      %c0_115 = arith.constant 0 : index
      %128 = vector.load %arg11[%c0_114, %c0_115] : memref<4x2xf32, #tpu.memory_space<vmem>>, vector<4x2xf32>
      tpu.vector_store %arg11[%c0_114, %c0_115], %127 {strides = array<i32>} : memref<4x2xf32, #tpu.memory_space<vmem>>, vector<4x2xf32>,
    } else {
    }
    %c0 = arith.constant 0 : index
    %c0_2 = arith.constant 0 : index
    %c0_3 = arith.constant 0 : index
    %c0_4 = arith.constant 0 : index
    %5 = vector.load %arg2[%c0, %c0_2, %c0_3, %c0_4] : memref<1x1x2x100xf32, #tpu.memory_space<vmem>>, vector<1x1x2x100xf32>
    %6 = vector.shape_cast %5 : vector<1x1x2x100xf32> to vector<2x100xf32>
    %c1_i32 = arith.constant 1 : i32
    %7 = arith.subi %arg1, %c1_i32 : i32
    %c0_i32_5 = arith.constant 0 : i32
    %8 = arith.addi %7, %c0_i32_5 : i32
    %c0_i32_6 = arith.constant 0 : i32
    %9 = arith.cmpi sge, %8, %c0_i32_6 : i32
    %c8_i32 = arith.constant 8 : i32
    %10 = arith.cmpi slt, %8, %c8_i32 : i32
    %11 = arith.andi %9, %10 : i1
    %cst = arith.constant 1.000000e+00 : f32
    %cst_7 = arith.constant 0.000000e+00 : f32
    %12 = arith.select %11, %cst, %cst_7 : f32
    %13 = vector.broadcast %12 : f32 to vector<2x100xf32>
    %14 = arith.mulf %6, %13 : vector<2x100xf32>
    %c0_8 = arith.constant 0 : index
    %c0_9 = arith.constant 0 : index
    %15 = vector.load %arg12[%c0_8, %c0_9] : memref<6x100xf32, #tpu.memory_space<vmem>>, vector<2x100xf32>
    tpu.vector_store %arg12[%c0_8, %c0_9], %14 {strides = array<i32>} : memref<6x100xf32, #tpu.memory_space<vmem>>, vector<2x100xf32>,
    %c0_10 = arith.constant 0 : index
    %c0_11 = arith.constant 0 : index
    %c0_12 = arith.constant 0 : index
    %c0_13 = arith.constant 0 : index
    %16 = vector.load %arg3[%c0_10, %c0_11, %c0_12, %c0_13] : memref<1x1x2x100xf32, #tpu.memory_space<vmem>>, vector<1x1x2x100xf32>
    %17 = vector.shape_cast %16 : vector<1x1x2x100xf32> to vector<2x100xf32>
    %c2 = arith.constant 2 : index
    %c0_14 = arith.constant 0 : index
    %18 = vector.load %arg12[%c2, %c0_14] : memref<6x100xf32, #tpu.memory_space<vmem>>, vector<2x100xf32>
    tpu.vector_store %arg12[%c2, %c0_14], %17 {strides = array<i32>} : memref<6x100xf32, #tpu.memory_space<vmem>>, vector<2x100xf32>,
    %c0_15 = arith.constant 0 : index
    %c0_16 = arith.constant 0 : index
    %c0_17 = arith.constant 0 : index
    %c0_18 = arith.constant 0 : index
    %19 = vector.load %arg4[%c0_15, %c0_16, %c0_17, %c0_18] : memref<1x1x2x100xf32, #tpu.memory_space<vmem>>, vector<1x1x2x100xf32>
    %20 = vector.shape_cast %19 : vector<1x1x2x100xf32> to vector<2x100xf32>
    %c1_i32_19 = arith.constant 1 : i32
    %21 = arith.subi %arg1, %c1_i32_19 : i32
    %c2_i32 = arith.constant 2 : i32
    %22 = arith.addi %21, %c2_i32 : i32
    %c0_i32_20 = arith.constant 0 : i32
    %23 = arith.cmpi sge, %22, %c0_i32_20 : i32
    %c8_i32_21 = arith.constant 8 : i32
    %24 = arith.cmpi slt, %22, %c8_i32_21 : i32
    %25 = arith.andi %23, %24 : i1
    %cst_22 = arith.constant 1.000000e+00 : f32
    %cst_23 = arith.constant 0.000000e+00 : f32
    %26 = arith.select %25, %cst_22, %cst_23 : f32
    %27 = vector.broadcast %26 : f32 to vector<2x100xf32>
    %28 = arith.mulf %20, %27 : vector<2x100xf32>
    %c4 = arith.constant 4 : index
    %c0_24 = arith.constant 0 : index
    %29 = vector.load %arg12[%c4, %c0_24] : memref<6x100xf32, #tpu.memory_space<vmem>>, vector<2x100xf32>
    tpu.vector_store %arg12[%c4, %c0_24], %28 {strides = array<i32>} : memref<6x100xf32, #tpu.memory_space<vmem>>, vector<2x100xf32>,
    %cst_25 = arith.constant 0.000000e+00 : f32
    %30 = vector.broadcast %cst_25 : f32 to vector<4x78xf32>
    %c0_26 = arith.constant 0 : index
    %c0_27 = arith.constant 0 : index
    %31 = vector.load %arg12[%c0_26, %c0_27] : memref<6x100xf32, #tpu.memory_space<vmem>>, vector<6x78xf32>
    %c0_28 = arith.constant 0 : index
    %c0_29 = arith.constant 0 : index
    %c0_30 = arith.constant 0 : index
    %32 = vector.load %arg5[%c0_28, %c0_29, %c0_30] : memref<9x4x6xf32, #tpu.memory_space<vmem>>, vector<1x4x6xf32>
    %33 = vector.shape_cast %32 : vector<1x4x6xf32> to vector<4x6xf32>
    %cst_31 = arith.constant dense<0.000000e+00> : vector<4x78xf32>
    %34 = tpu.matmul %33, %31, %cst_31 {dimension_numbers = #tpu.dot_dimension_numbers<[1], [0], [0], [1], [0, 0, 1, 1], [], []>} : vector<4x6xf32>, vector<6x78xf32>, vector<4x78xf32> -> vector<4x78xf32>
    %35 = arith.addf %30, %34 : vector<4x78xf32>
    %c0_32 = arith.constant 0 : index
    %c1 = arith.constant 1 : index
    %36 = vector.load %arg12[%c0_32, %c1] : memref<6x100xf32, #tpu.memory_space<vmem>>, vector<6x78xf32>
    %c1_33 = arith.constant 1 : index
    %c0_34 = arith.constant 0 : index
    %c0_35 = arith.constant 0 : index
    %37 = vector.load %arg5[%c1_33, %c0_34, %c0_35] : memref<9x4x6xf32, #tpu.memory_space<vmem>>, vector<1x4x6xf32>
    %38 = vector.shape_cast %37 : vector<1x4x6xf32> to vector<4x6xf32>
    %cst_36 = arith.constant dense<0.000000e+00> : vector<4x78xf32>
    %39 = tpu.matmul %38, %36, %cst_36 {dimension_numbers = #tpu.dot_dimension_numbers<[1], [0], [0], [1], [0, 0, 1, 1], [], []>} : vector<4x6xf32>, vector<6x78xf32>, vector<4x78xf32> -> vector<4x78xf32>
    %40 = arith.addf %35, %39 : vector<4x78xf32>
    %c0_37 = arith.constant 0 : index
    %c2_38 = arith.constant 2 : index
    %41 = vector.load %arg12[%c0_37, %c2_38] : memref<6x100xf32, #tpu.memory_space<vmem>>, vector<6x78xf32>
    %c2_39 = arith.constant 2 : index
    %c0_40 = arith.constant 0 : index
    %c0_41 = arith.constant 0 : index
    %42 = vector.load %arg5[%c2_39, %c0_40, %c0_41] : memref<9x4x6xf32, #tpu.memory_space<vmem>>, vector<1x4x6xf32>
    %43 = vector.shape_cast %42 : vector<1x4x6xf32> to vector<4x6xf32>
    %cst_42 = arith.constant dense<0.000000e+00> : vector<4x78xf32>
    %44 = tpu.matmul %43, %41, %cst_42 {dimension_numbers = #tpu.dot_dimension_numbers<[1], [0], [0], [1], [0, 0, 1, 1], [], []>} : vector<4x6xf32>, vector<6x78xf32>, vector<4x78xf32> -> vector<4x78xf32>
    %45 = arith.addf %40, %44 : vector<4x78xf32>
    %c0_43 = arith.constant 0 : index
    %c10 = arith.constant 10 : index
    %46 = vector.load %arg12[%c0_43, %c10] : memref<6x100xf32, #tpu.memory_space<vmem>>, vector<6x78xf32>
    %c3 = arith.constant 3 : index
    %c0_44 = arith.constant 0 : index
    %c0_45 = arith.constant 0 : index
    %47 = vector.load %arg5[%c3, %c0_44, %c0_45] : memref<9x4x6xf32, #tpu.memory_space<vmem>>, vector<1x4x6xf32>
    %48 = vector.shape_cast %47 : vector<1x4x6xf32> to vector<4x6xf32>
    %cst_46 = arith.constant dense<0.000000e+00> : vector<4x78xf32>
    %49 = tpu.matmul %48, %46, %cst_46 {dimension_numbers = #tpu.dot_dimension_numbers<[1], [0], [0], [1], [0, 0, 1, 1], [], []>} : vector<4x6xf32>, vector<6x78xf32>, vector<4x78xf32> -> vector<4x78xf32>
    %50 = arith.addf %45, %49 : vector<4x78xf32>
    %c0_47 = arith.constant 0 : index
    %c11 = arith.constant 11 : index
    %51 = vector.load %arg12[%c0_47, %c11] : memref<6x100xf32, #tpu.memory_space<vmem>>, vector<6x78xf32>
    %c4_48 = arith.constant 4 : index
    %c0_49 = arith.constant 0 : index
    %c0_50 = arith.constant 0 : index
    %52 = vector.load %arg5[%c4_48, %c0_49, %c0_50] : memref<9x4x6xf32, #tpu.memory_space<vmem>>, vector<1x4x6xf32>
    %53 = vector.shape_cast %52 : vector<1x4x6xf32> to vector<4x6xf32>
    %cst_51 = arith.constant dense<0.000000e+00> : vector<4x78xf32>
    %54 = tpu.matmul %53, %51, %cst_51 {dimension_numbers = #tpu.dot_dimension_numbers<[1], [0], [0], [1], [0, 0, 1, 1], [], []>} : vector<4x6xf32>, vector<6x78xf32>, vector<4x78xf32> -> vector<4x78xf32>
    %55 = arith.addf %50, %54 : vector<4x78xf32>
    %c0_52 = arith.constant 0 : index
    %c12 = arith.constant 12 : index
    %56 = vector.load %arg12[%c0_52, %c12] : memref<6x100xf32, #tpu.memory_space<vmem>>, vector<6x78xf32>
    %c5 = arith.constant 5 : index
    %c0_53 = arith.constant 0 : index
    %c0_54 = arith.constant 0 : index
    %57 = vector.load %arg5[%c5, %c0_53, %c0_54] : memref<9x4x6xf32, #tpu.memory_space<vmem>>, vector<1x4x6xf32>
    %58 = vector.shape_cast %57 : vector<1x4x6xf32> to vector<4x6xf32>
    %cst_55 = arith.constant dense<0.000000e+00> : vector<4x78xf32>
    %59 = tpu.matmul %58, %56, %cst_55 {dimension_numbers = #tpu.dot_dimension_numbers<[1], [0], [0], [1], [0, 0, 1, 1], [], []>} : vector<4x6xf32>, vector<6x78xf32>, vector<4x78xf32> -> vector<4x78xf32>
    %60 = arith.addf %55, %59 : vector<4x78xf32>
    %c0_56 = arith.constant 0 : index
    %c20 = arith.constant 20 : index
    %61 = vector.load %arg12[%c0_56, %c20] : memref<6x100xf32, #tpu.memory_space<vmem>>, vector<6x78xf32>
    %c6 = arith.constant 6 : index
    %c0_57 = arith.constant 0 : index
    %c0_58 = arith.constant 0 : index
    %62 = vector.load %arg5[%c6, %c0_57, %c0_58] : memref<9x4x6xf32, #tpu.memory_space<vmem>>, vector<1x4x6xf32>
    %63 = vector.shape_cast %62 : vector<1x4x6xf32> to vector<4x6xf32>
    %cst_59 = arith.constant dense<0.000000e+00> : vector<4x78xf32>
    %64 = tpu.matmul %63, %61, %cst_59 {dimension_numbers = #tpu.dot_dimension_numbers<[1], [0], [0], [1], [0, 0, 1, 1], [], []>} : vector<4x6xf32>, vector<6x78xf32>, vector<4x78xf32> -> vector<4x78xf32>
    %65 = arith.addf %60, %64 : vector<4x78xf32>
    %c0_60 = arith.constant 0 : index
    %c21 = arith.constant 21 : index
    %66 = vector.load %arg12[%c0_60, %c21] : memref<6x100xf32, #tpu.memory_space<vmem>>, vector<6x78xf32>
    %c7 = arith.constant 7 : index
    %c0_61 = arith.constant 0 : index
    %c0_62 = arith.constant 0 : index
    %67 = vector.load %arg5[%c7, %c0_61, %c0_62] : memref<9x4x6xf32, #tpu.memory_space<vmem>>, vector<1x4x6xf32>
    %68 = vector.shape_cast %67 : vector<1x4x6xf32> to vector<4x6xf32>
    %cst_63 = arith.constant dense<0.000000e+00> : vector<4x78xf32>
    %69 = tpu.matmul %68, %66, %cst_63 {dimension_numbers = #tpu.dot_dimension_numbers<[1], [0], [0], [1], [0, 0, 1, 1], [], []>} : vector<4x6xf32>, vector<6x78xf32>, vector<4x78xf32> -> vector<4x78xf32>
    %70 = arith.addf %65, %69 : vector<4x78xf32>
    %c0_64 = arith.constant 0 : index
    %c22 = arith.constant 22 : index
    %71 = vector.load %arg12[%c0_64, %c22] : memref<6x100xf32, #tpu.memory_space<vmem>>, vector<6x78xf32>
    %c8 = arith.constant 8 : index
    %c0_65 = arith.constant 0 : index
    %c0_66 = arith.constant 0 : index
    %72 = vector.load %arg5[%c8, %c0_65, %c0_66] : memref<9x4x6xf32, #tpu.memory_space<vmem>>, vector<1x4x6xf32>
    %73 = vector.shape_cast %72 : vector<1x4x6xf32> to vector<4x6xf32>
    %cst_67 = arith.constant dense<0.000000e+00> : vector<4x78xf32>
    %74 = tpu.matmul %73, %71, %cst_67 {dimension_numbers = #tpu.dot_dimension_numbers<[1], [0], [0], [1], [0, 0, 1, 1], [], []>} : vector<4x6xf32>, vector<6x78xf32>, vector<4x78xf32> -> vector<4x78xf32>
    %75 = arith.addf %70, %74 : vector<4x78xf32>
    %c0_68 = arith.constant 0 : index
    %c0_69 = arith.constant 0 : index
    %76 = vector.load %arg6[%c0_68, %c0_69] : memref<4x1xf32, #tpu.memory_space<vmem>>, vector<4x1xf32>
    %77 = vector.broadcast %76 : vector<4x1xf32> to vector<4x78xf32>
    %78 = arith.addf %75, %77 : vector<4x78xf32>
    %c0_70 = arith.constant 0 : index
    %c11_71 = arith.constant 11 : index
    %79 = vector.load %arg9[%c0_70, %c11_71] : memref<1x100xf32, #tpu.memory_space<vmem>>, vector<1x78xf32>
    %80 = vector.broadcast %79 : vector<1x78xf32> to vector<4x78xf32>
    %81 = arith.mulf %78, %80 : vector<4x78xf32>
    %c0_72 = arith.constant 0 : index
    %c0_73 = arith.constant 0 : index
    %82 = vector.load %arg11[%c0_72, %c0_73] : memref<4x2xf32, #tpu.memory_space<vmem>>, vector<4x1xf32>
    %cst_74 = arith.constant dense<0.000000e+00> : vector<4xf32>
    %83 = vector.multi_reduction <add>, %81, %cst_74 [1] : vector<4x78xf32> to vector<4xf32>
    %84 = vector.shape_cast %83 : vector<4xf32> to vector<4x1xf32>
    %85 = arith.addf %82, %84 : vector<4x1xf32>
    %c0_75 = arith.constant 0 : index
    %c0_76 = arith.constant 0 : index
    %86 = vector.load %arg11[%c0_75, %c0_76] : memref<4x2xf32, #tpu.memory_space<vmem>>, vector<4x1xf32>
    tpu.vector_store %arg11[%c0_75, %c0_76], %85 {strides = array<i32>} : memref<4x2xf32, #tpu.memory_space<vmem>>, vector<4x1xf32>,
    %c0_77 = arith.constant 0 : index
    %c1_78 = arith.constant 1 : index
    %87 = vector.load %arg11[%c0_77, %c1_78] : memref<4x2xf32, #tpu.memory_space<vmem>>, vector<4x1xf32>
    %88 = arith.mulf %81, %78 : vector<4x78xf32>
    %cst_79 = arith.constant dense<0.000000e+00> : vector<4xf32>
    %89 = vector.multi_reduction <add>, %88, %cst_79 [1] : vector<4x78xf32> to vector<4xf32>
    %90 = vector.shape_cast %89 : vector<4xf32> to vector<4x1xf32>
    %91 = arith.addf %87, %90 : vector<4x1xf32>
    %c0_80 = arith.constant 0 : index
    %c1_81 = arith.constant 1 : index
    %92 = vector.load %arg11[%c0_80, %c1_81] : memref<4x2xf32, #tpu.memory_space<vmem>>, vector<4x1xf32>
    tpu.vector_store %arg11[%c0_80, %c1_81], %91 {strides = array<i32>} : memref<4x2xf32, #tpu.memory_space<vmem>>, vector<4x1xf32>,
    %cst_82 = arith.constant 0.000000e+00 : f32
    %93 = vector.broadcast %cst_82 : f32 to vector<1x1x4x100xf32>
    %c0_83 = arith.constant 0 : index
    %c0_84 = arith.constant 0 : index
    %c0_85 = arith.constant 0 : index
    %c0_86 = arith.constant 0 : index
    %94 = vector.load %arg10[%c0_83, %c0_84, %c0_85, %c0_86] : memref<1x1x4x100xf32, #tpu.memory_space<vmem>>, vector<1x1x4x100xf32>
    tpu.vector_store %arg10[%c0_83, %c0_84, %c0_85, %c0_86], %93 {strides = array<i32>} : memref<1x1x4x100xf32, #tpu.memory_space<vmem>>, vector<1x1x4x100xf32>,
    %95 = vector.extract_strided_slice %78 {offsets = [0, 0], sizes = [4, 8], strides = [1, 1]} : vector<4x78xf32> to vector<4x8xf32>
    %c0_87 = arith.constant 0 : index
    %c0_88 = arith.constant 0 : index
    %c0_89 = arith.constant 0 : index
    %c11_90 = arith.constant 11 : index
    %96 = vector.load %arg10[%c0_87, %c0_88, %c0_89, %c11_90] : memref<1x1x4x100xf32, #tpu.memory_space<vmem>>, vector<1x1x4x8xf32>
    %97 = vector.shape_cast %96 : vector<1x1x4x8xf32> to vector<4x8xf32>
    %98 = vector.shape_cast %95 : vector<4x8xf32> to vector<1x1x4x8xf32>
    tpu.vector_store %arg10[%c0_87, %c0_88, %c0_89, %c11_90], %98 {strides = array<i32>} : memref<1x1x4x100xf32, #tpu.memory_space<vmem>>, vector<1x1x4x8xf32>,
    %99 = vector.extract_strided_slice %78 {offsets = [0, 10], sizes = [4, 8], strides = [1, 1]} : vector<4x78xf32> to vector<4x8xf32>
    %c0_91 = arith.constant 0 : index
    %c0_92 = arith.constant 0 : index
    %c0_93 = arith.constant 0 : index
    %c21_94 = arith.constant 21 : index
    %100 = vector.load %arg10[%c0_91, %c0_92, %c0_93, %c21_94] : memref<1x1x4x100xf32, #tpu.memory_space<vmem>>, vector<1x1x4x8xf32>
    %101 = vector.shape_cast %100 : vector<1x1x4x8xf32> to vector<4x8xf32>
    %102 = vector.shape_cast %99 : vector<4x8xf32> to vector<1x1x4x8xf32>
    tpu.vector_store %arg10[%c0_91, %c0_92, %c0_93, %c21_94], %102 {strides = array<i32>} : memref<1x1x4x100xf32, #tpu.memory_space<vmem>>, vector<1x1x4x8xf32>,
    %103 = vector.extract_strided_slice %78 {offsets = [0, 20], sizes = [4, 8], strides = [1, 1]} : vector<4x78xf32> to vector<4x8xf32>
    %c0_95 = arith.constant 0 : index
    %c0_96 = arith.constant 0 : index
    %c0_97 = arith.constant 0 : index
    %c31 = arith.constant 31 : index
    %104 = vector.load %arg10[%c0_95, %c0_96, %c0_97, %c31] : memref<1x1x4x100xf32, #tpu.memory_space<vmem>>, vector<1x1x4x8xf32>
    %105 = vector.shape_cast %104 : vector<1x1x4x8xf32> to vector<4x8xf32>
    %106 = vector.shape_cast %103 : vector<4x8xf32> to vector<1x1x4x8xf32>
    tpu.vector_store %arg10[%c0_95, %c0_96, %c0_97, %c31], %106 {strides = array<i32>} : memref<1x1x4x100xf32, #tpu.memory_space<vmem>>, vector<1x1x4x8xf32>,
    %107 = vector.extract_strided_slice %78 {offsets = [0, 30], sizes = [4, 8], strides = [1, 1]} : vector<4x78xf32> to vector<4x8xf32>
    %c0_98 = arith.constant 0 : index
    %c0_99 = arith.constant 0 : index
    %c0_100 = arith.constant 0 : index
    %c41 = arith.constant 41 : index
    %108 = vector.load %arg10[%c0_98, %c0_99, %c0_100, %c41] : memref<1x1x4x100xf32, #tpu.memory_space<vmem>>, vector<1x1x4x8xf32>
    %109 = vector.shape_cast %108 : vector<1x1x4x8xf32> to vector<4x8xf32>
    %110 = vector.shape_cast %107 : vector<4x8xf32> to vector<1x1x4x8xf32>
    tpu.vector_store %arg10[%c0_98, %c0_99, %c0_100, %c41], %110 {strides = array<i32>} : memref<1x1x4x100xf32, #tpu.memory_space<vmem>>, vector<1x1x4x8xf32>,
    %111 = vector.extract_strided_slice %78 {offsets = [0, 40], sizes = [4, 8], strides = [1, 1]} : vector<4x78xf32> to vector<4x8xf32>
    %c0_101 = arith.constant 0 : index
    %c0_102 = arith.constant 0 : index
    %c0_103 = arith.constant 0 : index
    %c51 = arith.constant 51 : index
    %112 = vector.load %arg10[%c0_101, %c0_102, %c0_103, %c51] : memref<1x1x4x100xf32, #tpu.memory_space<vmem>>, vector<1x1x4x8xf32>
    %113 = vector.shape_cast %112 : vector<1x1x4x8xf32> to vector<4x8xf32>
    %114 = vector.shape_cast %111 : vector<4x8xf32> to vector<1x1x4x8xf32>
    tpu.vector_store %arg10[%c0_101, %c0_102, %c0_103, %c51], %114 {strides = array<i32>} : memref<1x1x4x100xf32, #tpu.memory_space<vmem>>, vector<1x1x4x8xf32>,
    %115 = vector.extract_strided_slice %78 {offsets = [0, 50], sizes = [4, 8], strides = [1, 1]} : vector<4x78xf32> to vector<4x8xf32>
    %c0_104 = arith.constant 0 : index
    %c0_105 = arith.constant 0 : index
    %c0_106 = arith.constant 0 : index
    %c61 = arith.constant 61 : index
    %116 = vector.load %arg10[%c0_104, %c0_105, %c0_106, %c61] : memref<1x1x4x100xf32, #tpu.memory_space<vmem>>, vector<1x1x4x8xf32>
    %117 = vector.shape_cast %116 : vector<1x1x4x8xf32> to vector<4x8xf32>
    %118 = vector.shape_cast %115 : vector<4x8xf32> to vector<1x1x4x8xf32>
    tpu.vector_store %arg10[%c0_104, %c0_105, %c0_106, %c61], %118 {strides = array<i32>} : memref<1x1x4x100xf32, #tpu.memory_space<vmem>>, vector<1x1x4x8xf32>,
    %119 = vector.extract_strided_slice %78 {offsets = [0, 60], sizes = [4, 8], strides = [1, 1]} : vector<4x78xf32> to vector<4x8xf32>
    %c0_107 = arith.constant 0 : index
    %c0_108 = arith.constant 0 : index
    %c0_109 = arith.constant 0 : index
    %c71 = arith.constant 71 : index
    %120 = vector.load %arg10[%c0_107, %c0_108, %c0_109, %c71] : memref<1x1x4x100xf32, #tpu.memory_space<vmem>>, vector<1x1x4x8xf32>
    %121 = vector.shape_cast %120 : vector<1x1x4x8xf32> to vector<4x8xf32>
    %122 = vector.shape_cast %119 : vector<4x8xf32> to vector<1x1x4x8xf32>
    tpu.vector_store %arg10[%c0_107, %c0_108, %c0_109, %c71], %122 {strides = array<i32>} : memref<1x1x4x100xf32, #tpu.memory_space<vmem>>, vector<1x1x4x8xf32>,
    %123 = vector.extract_strided_slice %78 {offsets = [0, 70], sizes = [4, 8], strides = [1, 1]} : vector<4x78xf32> to vector<4x8xf32>
    %c0_110 = arith.constant 0 : index
    %c0_111 = arith.constant 0 : index
    %c0_112 = arith.constant 0 : index
    %c81 = arith.constant 81 : index
    %124 = vector.load %arg10[%c0_110, %c0_111, %c0_112, %c81] : memref<1x1x4x100xf32, #tpu.memory_space<vmem>>, vector<1x1x4x8xf32>
    %125 = vector.shape_cast %124 : vector<1x1x4x8xf32> to vector<4x8xf32>
    %126 = vector.shape_cast %123 : vector<4x8xf32> to vector<1x1x4x8xf32>
    tpu.vector_store %arg10[%c0_110, %c0_111, %c0_112, %c81], %126 {strides = array<i32>} : memref<1x1x4x100xf32, #tpu.memory_space<vmem>>, vector<1x1x4x8xf32>,
    return
  }
  func.func @transform_0(%arg0: i32, %arg1: i32) -> (i32, i32, i32, i32) {
    %c1_i32 = arith.constant 1 : i32
    %0 = arith.subi %arg1, %c1_i32 : i32
    %c0_i32 = arith.constant 0 : i32
    %1 = arith.maxsi %0, %c0_i32 : i32
    %c0_i32_0 = arith.constant 0 : i32
    %c0_i32_1 = arith.constant 0 : i32
    %c0_i32_2 = arith.constant 0 : i32
    return %arg0, %1, %c0_i32_0, %c0_i32_1 : i32, i32, i32, i32
  }
  func.func @transform_1(%arg0: i32, %arg1: i32) -> (i32, i32, i32, i32) {
    %c0_i32 = arith.constant 0 : i32
    %c0_i32_0 = arith.constant 0 : i32
    %c0_i32_1 = arith.constant 0 : i32
    return %arg0, %arg1, %c0_i32, %c0_i32_0 : i32, i32, i32, i32
  }
  func.func @transform_2(%arg0: i32, %arg1: i32) -> (i32, i32, i32, i32) {
    %c1_i32 = arith.constant 1 : i32
    %0 = arith.addi %arg1, %c1_i32 : i32
    %c7_i32 = arith.constant 7 : i32
    %1 = arith.minsi %0, %c7_i32 : i32
    %c0_i32 = arith.constant 0 : i32
    %c0_i32_0 = arith.constant 0 : i32
    %c0_i32_1 = arith.constant 0 : i32
    return %arg0, %1, %c0_i32, %c0_i32_0 : i32, i32, i32, i32
  }
  func.func @transform_3(%arg0: i32, %arg1: i32) -> (i32, i32, i32) {
    %c0_i32 = arith.constant 0 : i32
    %c0_i32_0 = arith.constant 0 : i32
    %c0_i32_1 = arith.constant 0 : i32
    %c0_i32_2 = arith.constant 0 : i32
    return %c0_i32, %c0_i32_0, %c0_i32_1 : i32, i32, i32
  }
  func.func @transform_4(%arg0: i32, %arg1: i32) -> (i32, i32) {
    %c0_i32 = arith.constant 0 : i32
    %c0_i32_0 = arith.constant 0 : i32
    %c0_i32_1 = arith.constant 0 : i32
    return %c0_i32, %c0_i32_0 : i32, i32
  }
  func.func @transform_5(%arg0: i32, %arg1: i32) -> (i32, i32) {
    %c0_i32 = arith.constant 0 : i32
    %c0_i32_0 = arith.constant 0 : i32
    %c0_i32_1 = arith.constant 0 : i32
    return %c0_i32, %c0_i32_0 : i32, i32
  }
  func.func @transform_6(%arg0: i32, %arg1: i32) -> (i32, i32) {
    %c0_i32 = arith.constant 0 : i32
    %c0_i32_0 = arith.constant 0 : i32
    %c0_i32_1 = arith.constant 0 : i32
    return %c0_i32, %c0_i32_0 : i32, i32
  }
  func.func @transform_7(%arg0: i32, %arg1: i32) -> (i32, i32) {
    %c0_i32 = arith.constant 0 : i32
    %c0_i32_0 = arith.constant 0 : i32
    %c0_i32_1 = arith.constant 0 : i32
    return %c0_i32, %c0_i32_0 : i32, i32
  }
  func.func @transform_8(%arg0: i32, %arg1: i32) -> (i32, i32, i32, i32) {
    %c0_i32 = arith.constant 0 : i32
    %c0_i32_0 = arith.constant 0 : i32
    %c0_i32_1 = arith.constant 0 : i32
    return %arg0, %arg1, %c0_i32, %c0_i32_0 : i32, i32, i32, i32
  }
  func.func @transform_9(%arg0: i32, %arg1: i32) -> (i32, i32) {
    %c0_i32 = arith.constant 0 : i32
    %c0_i32_0 = arith.constant 0 : i32
    %c0_i32_1 = arith.constant 0 : i32
    return %c0_i32, %c0_i32_0 : i32, i32
  }
}

module attributes {stable_mosaic.version = 11 : i64} {
  func.func @_epilogue_rescale_kernel(%arg0: i32, %arg1: i32, %arg2: memref<1x1x4x64xf32, #tpu.memory_space<vmem>>, %arg3: memref<1x1x4x64xf32, #tpu.memory_space<vmem>>, %arg4: memref<4x1xf32, #tpu.memory_space<vmem>>, %arg5: memref<4x1xf32, #tpu.memory_space<vmem>>, %arg6: memref<8x4xf32, #tpu.memory_space<vmem>>, %arg7: memref<8x1xf32, #tpu.memory_space<vmem>>, %arg8: memref<8x4xf32, #tpu.memory_space<vmem>>, %arg9: memref<8x1xf32, #tpu.memory_space<vmem>>, %arg10: memref<1x1x8x64xf32, #tpu.memory_space<vmem>>) attributes {dimension_semantics = [#tpu.dimension_semantics<parallel>, #tpu.dimension_semantics<parallel>], iteration_bounds = array<i64: 2, 8>, scalar_prefetch = 0 : i64, scratch_operands = 0 : i64, tpu.core_type = #tpu.core_type<tc>, window_params = [{transform_indices = @transform_0, window_bounds = array<i64: 1, 1, 4, 64>}, {transform_indices = @transform_1, window_bounds = array<i64: 1, 1, 4, 64>}, {pipeline_mode = #tpu.pipeline_mode<synchronous>, transform_indices = @transform_2, window_bounds = array<i64: 4, 1>}, {pipeline_mode = #tpu.pipeline_mode<synchronous>, transform_indices = @transform_3, window_bounds = array<i64: 4, 1>}, {pipeline_mode = #tpu.pipeline_mode<synchronous>, transform_indices = @transform_4, window_bounds = array<i64: 8, 4>}, {pipeline_mode = #tpu.pipeline_mode<synchronous>, transform_indices = @transform_5, window_bounds = array<i64: 8, 1>}, {pipeline_mode = #tpu.pipeline_mode<synchronous>, transform_indices = @transform_6, window_bounds = array<i64: 8, 4>}, {pipeline_mode = #tpu.pipeline_mode<synchronous>, transform_indices = @transform_7, window_bounds = array<i64: 8, 1>}, {transform_indices = @transform_8, window_bounds = array<i64: 1, 1, 8, 64>}]} {
    %c0 = arith.constant 0 : index
    %c0_0 = arith.constant 0 : index
    %c0_1 = arith.constant 0 : index
    %c0_2 = arith.constant 0 : index
    %0 = vector.load %arg2[%c0, %c0_0, %c0_1, %c0_2] : memref<1x1x4x64xf32, #tpu.memory_space<vmem>>, vector<1x1x4x64xf32>
    %1 = vector.shape_cast %0 : vector<1x1x4x64xf32> to vector<4x64xf32>
    %c0_3 = arith.constant 0 : index
    %c0_4 = arith.constant 0 : index
    %2 = vector.load %arg4[%c0_3, %c0_4] : memref<4x1xf32, #tpu.memory_space<vmem>>, vector<4x1xf32>
    %3 = vector.broadcast %2 : vector<4x1xf32> to vector<4x64xf32>
    %4 = arith.mulf %1, %3 : vector<4x64xf32>
    %c0_5 = arith.constant 0 : index
    %c0_6 = arith.constant 0 : index
    %5 = vector.load %arg5[%c0_5, %c0_6] : memref<4x1xf32, #tpu.memory_space<vmem>>, vector<4x1xf32>
    %6 = vector.broadcast %5 : vector<4x1xf32> to vector<4x64xf32>
    %7 = arith.addf %4, %6 : vector<4x64xf32>
    %cst = arith.constant 0.000000e+00 : f32
    %8 = vector.broadcast %cst : f32 to vector<4x64xf32>
    %9 = arith.maximumf %7, %8 : vector<4x64xf32>
    %c0_7 = arith.constant 0 : index
    %c0_8 = arith.constant 0 : index
    %10 = vector.load %arg6[%c0_7, %c0_8] : memref<8x4xf32, #tpu.memory_space<vmem>>, vector<8x4xf32>
    %cst_9 = arith.constant dense<0.000000e+00> : vector<8x64xf32>
    %11 = tpu.matmul %10, %9, %cst_9 {dimension_numbers = #tpu.dot_dimension_numbers<[1], [0], [0], [1], [0, 0, 1, 1], [], []>} : vector<8x4xf32>, vector<4x64xf32>, vector<8x64xf32> -> vector<8x64xf32>
    %c0_10 = arith.constant 0 : index
    %c0_11 = arith.constant 0 : index
    %12 = vector.load %arg7[%c0_10, %c0_11] : memref<8x1xf32, #tpu.memory_space<vmem>>, vector<8x1xf32>
    %13 = vector.broadcast %12 : vector<8x1xf32> to vector<8x64xf32>
    %14 = arith.addf %11, %13 : vector<8x64xf32>
    %c0_12 = arith.constant 0 : index
    %c0_13 = arith.constant 0 : index
    %15 = vector.load %arg8[%c0_12, %c0_13] : memref<8x4xf32, #tpu.memory_space<vmem>>, vector<8x4xf32>
    %c0_14 = arith.constant 0 : index
    %c0_15 = arith.constant 0 : index
    %c0_16 = arith.constant 0 : index
    %c0_17 = arith.constant 0 : index
    %16 = vector.load %arg3[%c0_14, %c0_15, %c0_16, %c0_17] : memref<1x1x4x64xf32, #tpu.memory_space<vmem>>, vector<1x1x4x64xf32>
    %17 = vector.shape_cast %16 : vector<1x1x4x64xf32> to vector<4x64xf32>
    %cst_18 = arith.constant dense<0.000000e+00> : vector<8x64xf32>
    %18 = tpu.matmul %15, %17, %cst_18 {dimension_numbers = #tpu.dot_dimension_numbers<[1], [0], [0], [1], [0, 0, 1, 1], [], []>} : vector<8x4xf32>, vector<4x64xf32>, vector<8x64xf32> -> vector<8x64xf32>
    %19 = arith.addf %14, %18 : vector<8x64xf32>
    %c0_19 = arith.constant 0 : index
    %c0_20 = arith.constant 0 : index
    %20 = vector.load %arg9[%c0_19, %c0_20] : memref<8x1xf32, #tpu.memory_space<vmem>>, vector<8x1xf32>
    %21 = vector.broadcast %20 : vector<8x1xf32> to vector<8x64xf32>
    %22 = arith.addf %19, %21 : vector<8x64xf32>
    %c0_21 = arith.constant 0 : index
    %c0_22 = arith.constant 0 : index
    %c0_23 = arith.constant 0 : index
    %c0_24 = arith.constant 0 : index
    %23 = vector.load %arg10[%c0_21, %c0_22, %c0_23, %c0_24] : memref<1x1x8x64xf32, #tpu.memory_space<vmem>>, vector<1x1x8x64xf32>
    %24 = vector.shape_cast %23 : vector<1x1x8x64xf32> to vector<8x64xf32>
    %25 = vector.shape_cast %22 : vector<8x64xf32> to vector<1x1x8x64xf32>
    tpu.vector_store %arg10[%c0_21, %c0_22, %c0_23, %c0_24], %25 {strides = array<i32>} : memref<1x1x8x64xf32, #tpu.memory_space<vmem>>, vector<1x1x8x64xf32>,
    return
  }
  func.func @transform_0(%arg0: i32, %arg1: i32) -> (i32, i32, i32, i32) {
    %c0_i32 = arith.constant 0 : i32
    %c0_i32_0 = arith.constant 0 : i32
    %c0_i32_1 = arith.constant 0 : i32
    return %arg0, %arg1, %c0_i32, %c0_i32_0 : i32, i32, i32, i32
  }
  func.func @transform_1(%arg0: i32, %arg1: i32) -> (i32, i32, i32, i32) {
    %c0_i32 = arith.constant 0 : i32
    %c0_i32_0 = arith.constant 0 : i32
    %c0_i32_1 = arith.constant 0 : i32
    return %arg0, %arg1, %c0_i32, %c0_i32_0 : i32, i32, i32, i32
  }
  func.func @transform_2(%arg0: i32, %arg1: i32) -> (i32, i32) {
    %c0_i32 = arith.constant 0 : i32
    %c0_i32_0 = arith.constant 0 : i32
    %c0_i32_1 = arith.constant 0 : i32
    return %c0_i32, %c0_i32_0 : i32, i32
  }
  func.func @transform_3(%arg0: i32, %arg1: i32) -> (i32, i32) {
    %c0_i32 = arith.constant 0 : i32
    %c0_i32_0 = arith.constant 0 : i32
    %c0_i32_1 = arith.constant 0 : i32
    return %c0_i32, %c0_i32_0 : i32, i32
  }
  func.func @transform_4(%arg0: i32, %arg1: i32) -> (i32, i32) {
    %c0_i32 = arith.constant 0 : i32
    %c0_i32_0 = arith.constant 0 : i32
    %c0_i32_1 = arith.constant 0 : i32
    return %c0_i32, %c0_i32_0 : i32, i32
  }
  func.func @transform_5(%arg0: i32, %arg1: i32) -> (i32, i32) {
    %c0_i32 = arith.constant 0 : i32
    %c0_i32_0 = arith.constant 0 : i32
    %c0_i32_1 = arith.constant 0 : i32
    return %c0_i32, %c0_i32_0 : i32, i32
  }
  func.func @transform_6(%arg0: i32, %arg1: i32) -> (i32, i32) {
    %c0_i32 = arith.constant 0 : i32
    %c0_i32_0 = arith.constant 0 : i32
    %c0_i32_1 = arith.constant 0 : i32
    return %c0_i32, %c0_i32_0 : i32, i32
  }
  func.func @transform_7(%arg0: i32, %arg1: i32) -> (i32, i32) {
    %c0_i32 = arith.constant 0 : i32
    %c0_i32_0 = arith.constant 0 : i32
    %c0_i32_1 = arith.constant 0 : i32
    return %c0_i32, %c0_i32_0 : i32, i32
  }
  func.func @transform_8(%arg0: i32, %arg1: i32) -> (i32, i32, i32, i32) {
    %c0_i32 = arith.constant 0 : i32
    %c0_i32_0 = arith.constant 0 : i32
    %c0_i32_1 = arith.constant 0 : i32
    return %arg0, %arg1, %c0_i32, %c0_i32_0 : i32, i32, i32, i32
  }
}

module attributes {stable_mosaic.version = 11 : i64} {
  func.func @_conv3d_kernel(%arg0: i32, %arg1: i32, %arg2: memref<1x1x4x100xf32, #tpu.memory_space<vmem>>, %arg3: memref<1x1x4x100xf32, #tpu.memory_space<vmem>>, %arg4: memref<1x1x4x100xf32, #tpu.memory_space<vmem>>, %arg5: memref<9x4x12xf32, #tpu.memory_space<vmem>>, %arg6: memref<4x1xf32, #tpu.memory_space<vmem>>, %arg7: memref<4x1xf32, #tpu.memory_space<vmem>>, %arg8: memref<4x1xf32, #tpu.memory_space<vmem>>, %arg9: memref<1x100xf32, #tpu.memory_space<vmem>>, %arg10: memref<1x1x4x64xf32, #tpu.memory_space<vmem>>, %arg11: memref<4x2xf32, #tpu.memory_space<vmem>>, %arg12: memref<12x100xf32, #tpu.memory_space<vmem>>) attributes {dimension_semantics = [#tpu.dimension_semantics<arbitrary>, #tpu.dimension_semantics<arbitrary>], iteration_bounds = array<i64: 2, 8>, scalar_prefetch = 0 : i64, scratch_operands = 1 : i64, tpu.core_type = #tpu.core_type<tc>, window_params = [{transform_indices = @transform_0, window_bounds = array<i64: 1, 1, 4, 100>}, {transform_indices = @transform_1, window_bounds = array<i64: 1, 1, 4, 100>}, {transform_indices = @transform_2, window_bounds = array<i64: 1, 1, 4, 100>}, {pipeline_mode = #tpu.pipeline_mode<synchronous>, transform_indices = @transform_3, window_bounds = array<i64: 9, 4, 12>}, {pipeline_mode = #tpu.pipeline_mode<synchronous>, transform_indices = @transform_4, window_bounds = array<i64: 4, 1>}, {pipeline_mode = #tpu.pipeline_mode<synchronous>, transform_indices = @transform_5, window_bounds = array<i64: 4, 1>}, {pipeline_mode = #tpu.pipeline_mode<synchronous>, transform_indices = @transform_6, window_bounds = array<i64: 4, 1>}, {pipeline_mode = #tpu.pipeline_mode<synchronous>, transform_indices = @transform_7, window_bounds = array<i64: 1, 100>}, {transform_indices = @transform_8, window_bounds = array<i64: 1, 1, 4, 64>}, {pipeline_mode = #tpu.pipeline_mode<synchronous>, transform_indices = @transform_9, window_bounds = array<i64: 4, 2>}]} {
    %c0_i32 = arith.constant 0 : i32
    %0 = arith.cmpi eq, %arg0, %c0_i32 : i32
    %c0_i32_0 = arith.constant 0 : i32
    %1 = arith.cmpi eq, %arg1, %c0_i32_0 : i32
    %2 = arith.andi %0, %1 : i1
    %3 = arith.extui %2 : i1 to i32
    %c0_i32_1 = arith.constant 0 : i32
    %4 = arith.cmpi ne, %3, %c0_i32_1 : i32
    scf.if %4 {
      %cst_129 = arith.constant 0.000000e+00 : f32
      %158 = vector.broadcast %cst_129 : f32 to vector<4x2xf32>
      %c0_130 = arith.constant 0 : index
      %c0_131 = arith.constant 0 : index
      %159 = vector.load %arg11[%c0_130, %c0_131] : memref<4x2xf32, #tpu.memory_space<vmem>>, vector<4x2xf32>
      tpu.vector_store %arg11[%c0_130, %c0_131], %158 {strides = array<i32>} : memref<4x2xf32, #tpu.memory_space<vmem>>, vector<4x2xf32>,
    } else {
    }
    %c0 = arith.constant 0 : index
    %c0_2 = arith.constant 0 : index
    %c0_3 = arith.constant 0 : index
    %c0_4 = arith.constant 0 : index
    %5 = vector.load %arg2[%c0, %c0_2, %c0_3, %c0_4] : memref<1x1x4x100xf32, #tpu.memory_space<vmem>>, vector<1x1x4x100xf32>
    %6 = vector.shape_cast %5 : vector<1x1x4x100xf32> to vector<4x100xf32>
    %c0_5 = arith.constant 0 : index
    %c0_6 = arith.constant 0 : index
    %7 = vector.load %arg7[%c0_5, %c0_6] : memref<4x1xf32, #tpu.memory_space<vmem>>, vector<4x1xf32>
    %8 = vector.broadcast %7 : vector<4x1xf32> to vector<4x100xf32>
    %9 = arith.mulf %6, %8 : vector<4x100xf32>
    %c0_7 = arith.constant 0 : index
    %c0_8 = arith.constant 0 : index
    %10 = vector.load %arg8[%c0_7, %c0_8] : memref<4x1xf32, #tpu.memory_space<vmem>>, vector<4x1xf32>
    %11 = vector.broadcast %10 : vector<4x1xf32> to vector<4x100xf32>
    %12 = arith.addf %9, %11 : vector<4x100xf32>
    %cst = arith.constant 0.000000e+00 : f32
    %13 = vector.broadcast %cst : f32 to vector<4x100xf32>
    %14 = arith.maximumf %12, %13 : vector<4x100xf32>
    %c0_9 = arith.constant 0 : index
    %c0_10 = arith.constant 0 : index
    %15 = vector.load %arg9[%c0_9, %c0_10] : memref<1x100xf32, #tpu.memory_space<vmem>>, vector<1x100xf32>
    %16 = vector.broadcast %15 : vector<1x100xf32> to vector<4x100xf32>
    %17 = arith.mulf %14, %16 : vector<4x100xf32>
    %c1_i32 = arith.constant 1 : i32
    %18 = arith.subi %arg1, %c1_i32 : i32
    %c0_i32_11 = arith.constant 0 : i32
    %19 = arith.addi %18, %c0_i32_11 : i32
    %c0_i32_12 = arith.constant 0 : i32
    %20 = arith.cmpi sge, %19, %c0_i32_12 : i32
    %c8_i32 = arith.constant 8 : i32
    %21 = arith.cmpi slt, %19, %c8_i32 : i32
    %22 = arith.andi %20, %21 : i1
    %cst_13 = arith.constant 1.000000e+00 : f32
    %cst_14 = arith.constant 0.000000e+00 : f32
    %23 = arith.select %22, %cst_13, %cst_14 : f32
    %24 = vector.broadcast %23 : f32 to vector<4x100xf32>
    %25 = arith.mulf %17, %24 : vector<4x100xf32>
    %c0_15 = arith.constant 0 : index
    %c0_16 = arith.constant 0 : index
    %26 = vector.load %arg12[%c0_15, %c0_16] : memref<12x100xf32, #tpu.memory_space<vmem>>, vector<4x100xf32>
    tpu.vector_store %arg12[%c0_15, %c0_16], %25 {strides = array<i32>} : memref<12x100xf32, #tpu.memory_space<vmem>>, vector<4x100xf32>,
    %c0_17 = arith.constant 0 : index
    %c0_18 = arith.constant 0 : index
    %c0_19 = arith.constant 0 : index
    %c0_20 = arith.constant 0 : index
    %27 = vector.load %arg3[%c0_17, %c0_18, %c0_19, %c0_20] : memref<1x1x4x100xf32, #tpu.memory_space<vmem>>, vector<1x1x4x100xf32>
    %28 = vector.shape_cast %27 : vector<1x1x4x100xf32> to vector<4x100xf32>
    %c0_21 = arith.constant 0 : index
    %c0_22 = arith.constant 0 : index
    %29 = vector.load %arg7[%c0_21, %c0_22] : memref<4x1xf32, #tpu.memory_space<vmem>>, vector<4x1xf32>
    %30 = vector.broadcast %29 : vector<4x1xf32> to vector<4x100xf32>
    %31 = arith.mulf %28, %30 : vector<4x100xf32>
    %c0_23 = arith.constant 0 : index
    %c0_24 = arith.constant 0 : index
    %32 = vector.load %arg8[%c0_23, %c0_24] : memref<4x1xf32, #tpu.memory_space<vmem>>, vector<4x1xf32>
    %33 = vector.broadcast %32 : vector<4x1xf32> to vector<4x100xf32>
    %34 = arith.addf %31, %33 : vector<4x100xf32>
    %cst_25 = arith.constant 0.000000e+00 : f32
    %35 = vector.broadcast %cst_25 : f32 to vector<4x100xf32>
    %36 = arith.maximumf %34, %35 : vector<4x100xf32>
    %c0_26 = arith.constant 0 : index
    %c0_27 = arith.constant 0 : index
    %37 = vector.load %arg9[%c0_26, %c0_27] : memref<1x100xf32, #tpu.memory_space<vmem>>, vector<1x100xf32>
    %38 = vector.broadcast %37 : vector<1x100xf32> to vector<4x100xf32>
    %39 = arith.mulf %36, %38 : vector<4x100xf32>
    %c4 = arith.constant 4 : index
    %c0_28 = arith.constant 0 : index
    %40 = vector.load %arg12[%c4, %c0_28] : memref<12x100xf32, #tpu.memory_space<vmem>>, vector<4x100xf32>
    tpu.vector_store %arg12[%c4, %c0_28], %39 {strides = array<i32>} : memref<12x100xf32, #tpu.memory_space<vmem>>, vector<4x100xf32>,
    %c0_29 = arith.constant 0 : index
    %c0_30 = arith.constant 0 : index
    %c0_31 = arith.constant 0 : index
    %c0_32 = arith.constant 0 : index
    %41 = vector.load %arg4[%c0_29, %c0_30, %c0_31, %c0_32] : memref<1x1x4x100xf32, #tpu.memory_space<vmem>>, vector<1x1x4x100xf32>
    %42 = vector.shape_cast %41 : vector<1x1x4x100xf32> to vector<4x100xf32>
    %c0_33 = arith.constant 0 : index
    %c0_34 = arith.constant 0 : index
    %43 = vector.load %arg7[%c0_33, %c0_34] : memref<4x1xf32, #tpu.memory_space<vmem>>, vector<4x1xf32>
    %44 = vector.broadcast %43 : vector<4x1xf32> to vector<4x100xf32>
    %45 = arith.mulf %42, %44 : vector<4x100xf32>
    %c0_35 = arith.constant 0 : index
    %c0_36 = arith.constant 0 : index
    %46 = vector.load %arg8[%c0_35, %c0_36] : memref<4x1xf32, #tpu.memory_space<vmem>>, vector<4x1xf32>
    %47 = vector.broadcast %46 : vector<4x1xf32> to vector<4x100xf32>
    %48 = arith.addf %45, %47 : vector<4x100xf32>
    %cst_37 = arith.constant 0.000000e+00 : f32
    %49 = vector.broadcast %cst_37 : f32 to vector<4x100xf32>
    %50 = arith.maximumf %48, %49 : vector<4x100xf32>
    %c0_38 = arith.constant 0 : index
    %c0_39 = arith.constant 0 : index
    %51 = vector.load %arg9[%c0_38, %c0_39] : memref<1x100xf32, #tpu.memory_space<vmem>>, vector<1x100xf32>
    %52 = vector.broadcast %51 : vector<1x100xf32> to vector<4x100xf32>
    %53 = arith.mulf %50, %52 : vector<4x100xf32>
    %c1_i32_40 = arith.constant 1 : i32
    %54 = arith.subi %arg1, %c1_i32_40 : i32
    %c2_i32 = arith.constant 2 : i32
    %55 = arith.addi %54, %c2_i32 : i32
    %c0_i32_41 = arith.constant 0 : i32
    %56 = arith.cmpi sge, %55, %c0_i32_41 : i32
    %c8_i32_42 = arith.constant 8 : i32
    %57 = arith.cmpi slt, %55, %c8_i32_42 : i32
    %58 = arith.andi %56, %57 : i1
    %cst_43 = arith.constant 1.000000e+00 : f32
    %cst_44 = arith.constant 0.000000e+00 : f32
    %59 = arith.select %58, %cst_43, %cst_44 : f32
    %60 = vector.broadcast %59 : f32 to vector<4x100xf32>
    %61 = arith.mulf %53, %60 : vector<4x100xf32>
    %c8 = arith.constant 8 : index
    %c0_45 = arith.constant 0 : index
    %62 = vector.load %arg12[%c8, %c0_45] : memref<12x100xf32, #tpu.memory_space<vmem>>, vector<4x100xf32>
    tpu.vector_store %arg12[%c8, %c0_45], %61 {strides = array<i32>} : memref<12x100xf32, #tpu.memory_space<vmem>>, vector<4x100xf32>,
    %cst_46 = arith.constant 0.000000e+00 : f32
    %63 = vector.broadcast %cst_46 : f32 to vector<4x78xf32>
    %c0_47 = arith.constant 0 : index
    %c0_48 = arith.constant 0 : index
    %64 = vector.load %arg12[%c0_47, %c0_48] : memref<12x100xf32, #tpu.memory_space<vmem>>, vector<12x78xf32>
    %c0_49 = arith.constant 0 : index
    %c0_50 = arith.constant 0 : index
    %c0_51 = arith.constant 0 : index
    %65 = vector.load %arg5[%c0_49, %c0_50, %c0_51] : memref<9x4x12xf32, #tpu.memory_space<vmem>>, vector<1x4x12xf32>
    %66 = vector.shape_cast %65 : vector<1x4x12xf32> to vector<4x12xf32>
    %cst_52 = arith.constant dense<0.000000e+00> : vector<4x78xf32>
    %67 = tpu.matmul %66, %64, %cst_52 {dimension_numbers = #tpu.dot_dimension_numbers<[1], [0], [0], [1], [0, 0, 1, 1], [], []>} : vector<4x12xf32>, vector<12x78xf32>, vector<4x78xf32> -> vector<4x78xf32>
    %68 = arith.addf %63, %67 : vector<4x78xf32>
    %c0_53 = arith.constant 0 : index
    %c1 = arith.constant 1 : index
    %69 = vector.load %arg12[%c0_53, %c1] : memref<12x100xf32, #tpu.memory_space<vmem>>, vector<12x78xf32>
    %c1_54 = arith.constant 1 : index
    %c0_55 = arith.constant 0 : index
    %c0_56 = arith.constant 0 : index
    %70 = vector.load %arg5[%c1_54, %c0_55, %c0_56] : memref<9x4x12xf32, #tpu.memory_space<vmem>>, vector<1x4x12xf32>
    %71 = vector.shape_cast %70 : vector<1x4x12xf32> to vector<4x12xf32>
    %cst_57 = arith.constant dense<0.000000e+00> : vector<4x78xf32>
    %72 = tpu.matmul %71, %69, %cst_57 {dimension_numbers = #tpu.dot_dimension_numbers<[1], [0], [0], [1], [0, 0, 1, 1], [], []>} : vector<4x12xf32>, vector<12x78xf32>, vector<4x78xf32> -> vector<4x78xf32>
    %73 = arith.addf %68, %72 : vector<4x78xf32>
    %c0_58 = arith.constant 0 : index
    %c2 = arith.constant 2 : index
    %74 = vector.load %arg12[%c0_58, %c2] : memref<12x100xf32, #tpu.memory_space<vmem>>, vector<12x78xf32>
    %c2_59 = arith.constant 2 : index
    %c0_60 = arith.constant 0 : index
    %c0_61 = arith.constant 0 : index
    %75 = vector.load %arg5[%c2_59, %c0_60, %c0_61] : memref<9x4x12xf32, #tpu.memory_space<vmem>>, vector<1x4x12xf32>
    %76 = vector.shape_cast %75 : vector<1x4x12xf32> to vector<4x12xf32>
    %cst_62 = arith.constant dense<0.000000e+00> : vector<4x78xf32>
    %77 = tpu.matmul %76, %74, %cst_62 {dimension_numbers = #tpu.dot_dimension_numbers<[1], [0], [0], [1], [0, 0, 1, 1], [], []>} : vector<4x12xf32>, vector<12x78xf32>, vector<4x78xf32> -> vector<4x78xf32>
    %78 = arith.addf %73, %77 : vector<4x78xf32>
    %c0_63 = arith.constant 0 : index
    %c10 = arith.constant 10 : index
    %79 = vector.load %arg12[%c0_63, %c10] : memref<12x100xf32, #tpu.memory_space<vmem>>, vector<12x78xf32>
    %c3 = arith.constant 3 : index
    %c0_64 = arith.constant 0 : index
    %c0_65 = arith.constant 0 : index
    %80 = vector.load %arg5[%c3, %c0_64, %c0_65] : memref<9x4x12xf32, #tpu.memory_space<vmem>>, vector<1x4x12xf32>
    %81 = vector.shape_cast %80 : vector<1x4x12xf32> to vector<4x12xf32>
    %cst_66 = arith.constant dense<0.000000e+00> : vector<4x78xf32>
    %82 = tpu.matmul %81, %79, %cst_66 {dimension_numbers = #tpu.dot_dimension_numbers<[1], [0], [0], [1], [0, 0, 1, 1], [], []>} : vector<4x12xf32>, vector<12x78xf32>, vector<4x78xf32> -> vector<4x78xf32>
    %83 = arith.addf %78, %82 : vector<4x78xf32>
    %c0_67 = arith.constant 0 : index
    %c11 = arith.constant 11 : index
    %84 = vector.load %arg12[%c0_67, %c11] : memref<12x100xf32, #tpu.memory_space<vmem>>, vector<12x78xf32>
    %c4_68 = arith.constant 4 : index
    %c0_69 = arith.constant 0 : index
    %c0_70 = arith.constant 0 : index
    %85 = vector.load %arg5[%c4_68, %c0_69, %c0_70] : memref<9x4x12xf32, #tpu.memory_space<vmem>>, vector<1x4x12xf32>
    %86 = vector.shape_cast %85 : vector<1x4x12xf32> to vector<4x12xf32>
    %cst_71 = arith.constant dense<0.000000e+00> : vector<4x78xf32>
    %87 = tpu.matmul %86, %84, %cst_71 {dimension_numbers = #tpu.dot_dimension_numbers<[1], [0], [0], [1], [0, 0, 1, 1], [], []>} : vector<4x12xf32>, vector<12x78xf32>, vector<4x78xf32> -> vector<4x78xf32>
    %88 = arith.addf %83, %87 : vector<4x78xf32>
    %c0_72 = arith.constant 0 : index
    %c12 = arith.constant 12 : index
    %89 = vector.load %arg12[%c0_72, %c12] : memref<12x100xf32, #tpu.memory_space<vmem>>, vector<12x78xf32>
    %c5 = arith.constant 5 : index
    %c0_73 = arith.constant 0 : index
    %c0_74 = arith.constant 0 : index
    %90 = vector.load %arg5[%c5, %c0_73, %c0_74] : memref<9x4x12xf32, #tpu.memory_space<vmem>>, vector<1x4x12xf32>
    %91 = vector.shape_cast %90 : vector<1x4x12xf32> to vector<4x12xf32>
    %cst_75 = arith.constant dense<0.000000e+00> : vector<4x78xf32>
    %92 = tpu.matmul %91, %89, %cst_75 {dimension_numbers = #tpu.dot_dimension_numbers<[1], [0], [0], [1], [0, 0, 1, 1], [], []>} : vector<4x12xf32>, vector<12x78xf32>, vector<4x78xf32> -> vector<4x78xf32>
    %93 = arith.addf %88, %92 : vector<4x78xf32>
    %c0_76 = arith.constant 0 : index
    %c20 = arith.constant 20 : index
    %94 = vector.load %arg12[%c0_76, %c20] : memref<12x100xf32, #tpu.memory_space<vmem>>, vector<12x78xf32>
    %c6 = arith.constant 6 : index
    %c0_77 = arith.constant 0 : index
    %c0_78 = arith.constant 0 : index
    %95 = vector.load %arg5[%c6, %c0_77, %c0_78] : memref<9x4x12xf32, #tpu.memory_space<vmem>>, vector<1x4x12xf32>
    %96 = vector.shape_cast %95 : vector<1x4x12xf32> to vector<4x12xf32>
    %cst_79 = arith.constant dense<0.000000e+00> : vector<4x78xf32>
    %97 = tpu.matmul %96, %94, %cst_79 {dimension_numbers = #tpu.dot_dimension_numbers<[1], [0], [0], [1], [0, 0, 1, 1], [], []>} : vector<4x12xf32>, vector<12x78xf32>, vector<4x78xf32> -> vector<4x78xf32>
    %98 = arith.addf %93, %97 : vector<4x78xf32>
    %c0_80 = arith.constant 0 : index
    %c21 = arith.constant 21 : index
    %99 = vector.load %arg12[%c0_80, %c21] : memref<12x100xf32, #tpu.memory_space<vmem>>, vector<12x78xf32>
    %c7 = arith.constant 7 : index
    %c0_81 = arith.constant 0 : index
    %c0_82 = arith.constant 0 : index
    %100 = vector.load %arg5[%c7, %c0_81, %c0_82] : memref<9x4x12xf32, #tpu.memory_space<vmem>>, vector<1x4x12xf32>
    %101 = vector.shape_cast %100 : vector<1x4x12xf32> to vector<4x12xf32>
    %cst_83 = arith.constant dense<0.000000e+00> : vector<4x78xf32>
    %102 = tpu.matmul %101, %99, %cst_83 {dimension_numbers = #tpu.dot_dimension_numbers<[1], [0], [0], [1], [0, 0, 1, 1], [], []>} : vector<4x12xf32>, vector<12x78xf32>, vector<4x78xf32> -> vector<4x78xf32>
    %103 = arith.addf %98, %102 : vector<4x78xf32>
    %c0_84 = arith.constant 0 : index
    %c22 = arith.constant 22 : index
    %104 = vector.load %arg12[%c0_84, %c22] : memref<12x100xf32, #tpu.memory_space<vmem>>, vector<12x78xf32>
    %c8_85 = arith.constant 8 : index
    %c0_86 = arith.constant 0 : index
    %c0_87 = arith.constant 0 : index
    %105 = vector.load %arg5[%c8_85, %c0_86, %c0_87] : memref<9x4x12xf32, #tpu.memory_space<vmem>>, vector<1x4x12xf32>
    %106 = vector.shape_cast %105 : vector<1x4x12xf32> to vector<4x12xf32>
    %cst_88 = arith.constant dense<0.000000e+00> : vector<4x78xf32>
    %107 = tpu.matmul %106, %104, %cst_88 {dimension_numbers = #tpu.dot_dimension_numbers<[1], [0], [0], [1], [0, 0, 1, 1], [], []>} : vector<4x12xf32>, vector<12x78xf32>, vector<4x78xf32> -> vector<4x78xf32>
    %108 = arith.addf %103, %107 : vector<4x78xf32>
    %c0_89 = arith.constant 0 : index
    %c0_90 = arith.constant 0 : index
    %109 = vector.load %arg6[%c0_89, %c0_90] : memref<4x1xf32, #tpu.memory_space<vmem>>, vector<4x1xf32>
    %110 = vector.broadcast %109 : vector<4x1xf32> to vector<4x78xf32>
    %111 = arith.addf %108, %110 : vector<4x78xf32>
    %c0_91 = arith.constant 0 : index
    %c11_92 = arith.constant 11 : index
    %112 = vector.load %arg9[%c0_91, %c11_92] : memref<1x100xf32, #tpu.memory_space<vmem>>, vector<1x78xf32>
    %113 = vector.broadcast %112 : vector<1x78xf32> to vector<4x78xf32>
    %114 = arith.mulf %111, %113 : vector<4x78xf32>
    %c0_93 = arith.constant 0 : index
    %c0_94 = arith.constant 0 : index
    %115 = vector.load %arg11[%c0_93, %c0_94] : memref<4x2xf32, #tpu.memory_space<vmem>>, vector<4x1xf32>
    %cst_95 = arith.constant dense<0.000000e+00> : vector<4xf32>
    %116 = vector.multi_reduction <add>, %114, %cst_95 [1] : vector<4x78xf32> to vector<4xf32>
    %117 = vector.shape_cast %116 : vector<4xf32> to vector<4x1xf32>
    %118 = arith.addf %115, %117 : vector<4x1xf32>
    %c0_96 = arith.constant 0 : index
    %c0_97 = arith.constant 0 : index
    %119 = vector.load %arg11[%c0_96, %c0_97] : memref<4x2xf32, #tpu.memory_space<vmem>>, vector<4x1xf32>
    tpu.vector_store %arg11[%c0_96, %c0_97], %118 {strides = array<i32>} : memref<4x2xf32, #tpu.memory_space<vmem>>, vector<4x1xf32>,
    %c0_98 = arith.constant 0 : index
    %c1_99 = arith.constant 1 : index
    %120 = vector.load %arg11[%c0_98, %c1_99] : memref<4x2xf32, #tpu.memory_space<vmem>>, vector<4x1xf32>
    %121 = arith.mulf %114, %111 : vector<4x78xf32>
    %cst_100 = arith.constant dense<0.000000e+00> : vector<4xf32>
    %122 = vector.multi_reduction <add>, %121, %cst_100 [1] : vector<4x78xf32> to vector<4xf32>
    %123 = vector.shape_cast %122 : vector<4xf32> to vector<4x1xf32>
    %124 = arith.addf %120, %123 : vector<4x1xf32>
    %c0_101 = arith.constant 0 : index
    %c1_102 = arith.constant 1 : index
    %125 = vector.load %arg11[%c0_101, %c1_102] : memref<4x2xf32, #tpu.memory_space<vmem>>, vector<4x1xf32>
    tpu.vector_store %arg11[%c0_101, %c1_102], %124 {strides = array<i32>} : memref<4x2xf32, #tpu.memory_space<vmem>>, vector<4x1xf32>,
    %126 = vector.extract_strided_slice %111 {offsets = [0, 0], sizes = [4, 8], strides = [1, 1]} : vector<4x78xf32> to vector<4x8xf32>
    %c0_103 = arith.constant 0 : index
    %c0_104 = arith.constant 0 : index
    %c0_105 = arith.constant 0 : index
    %c0_106 = arith.constant 0 : index
    %127 = vector.load %arg10[%c0_103, %c0_104, %c0_105, %c0_106] : memref<1x1x4x64xf32, #tpu.memory_space<vmem>>, vector<1x1x4x8xf32>
    %128 = vector.shape_cast %127 : vector<1x1x4x8xf32> to vector<4x8xf32>
    %129 = vector.shape_cast %126 : vector<4x8xf32> to vector<1x1x4x8xf32>
    tpu.vector_store %arg10[%c0_103, %c0_104, %c0_105, %c0_106], %129 {strides = array<i32>} : memref<1x1x4x64xf32, #tpu.memory_space<vmem>>, vector<1x1x4x8xf32>,
    %130 = vector.extract_strided_slice %111 {offsets = [0, 10], sizes = [4, 8], strides = [1, 1]} : vector<4x78xf32> to vector<4x8xf32>
    %c0_107 = arith.constant 0 : index
    %c0_108 = arith.constant 0 : index
    %c0_109 = arith.constant 0 : index
    %c8_110 = arith.constant 8 : index
    %131 = vector.load %arg10[%c0_107, %c0_108, %c0_109, %c8_110] : memref<1x1x4x64xf32, #tpu.memory_space<vmem>>, vector<1x1x4x8xf32>
    %132 = vector.shape_cast %131 : vector<1x1x4x8xf32> to vector<4x8xf32>
    %133 = vector.shape_cast %130 : vector<4x8xf32> to vector<1x1x4x8xf32>
    tpu.vector_store %arg10[%c0_107, %c0_108, %c0_109, %c8_110], %133 {strides = array<i32>} : memref<1x1x4x64xf32, #tpu.memory_space<vmem>>, vector<1x1x4x8xf32>,
    %134 = vector.extract_strided_slice %111 {offsets = [0, 20], sizes = [4, 8], strides = [1, 1]} : vector<4x78xf32> to vector<4x8xf32>
    %c0_111 = arith.constant 0 : index
    %c0_112 = arith.constant 0 : index
    %c0_113 = arith.constant 0 : index
    %c16 = arith.constant 16 : index
    %135 = vector.load %arg10[%c0_111, %c0_112, %c0_113, %c16] : memref<1x1x4x64xf32, #tpu.memory_space<vmem>>, vector<1x1x4x8xf32>
    %136 = vector.shape_cast %135 : vector<1x1x4x8xf32> to vector<4x8xf32>
    %137 = vector.shape_cast %134 : vector<4x8xf32> to vector<1x1x4x8xf32>
    tpu.vector_store %arg10[%c0_111, %c0_112, %c0_113, %c16], %137 {strides = array<i32>} : memref<1x1x4x64xf32, #tpu.memory_space<vmem>>, vector<1x1x4x8xf32>,
    %138 = vector.extract_strided_slice %111 {offsets = [0, 30], sizes = [4, 8], strides = [1, 1]} : vector<4x78xf32> to vector<4x8xf32>
    %c0_114 = arith.constant 0 : index
    %c0_115 = arith.constant 0 : index
    %c0_116 = arith.constant 0 : index
    %c24 = arith.constant 24 : index
    %139 = vector.load %arg10[%c0_114, %c0_115, %c0_116, %c24] : memref<1x1x4x64xf32, #tpu.memory_space<vmem>>, vector<1x1x4x8xf32>
    %140 = vector.shape_cast %139 : vector<1x1x4x8xf32> to vector<4x8xf32>
    %141 = vector.shape_cast %138 : vector<4x8xf32> to vector<1x1x4x8xf32>
    tpu.vector_store %arg10[%c0_114, %c0_115, %c0_116, %c24], %141 {strides = array<i32>} : memref<1x1x4x64xf32, #tpu.memory_space<vmem>>, vector<1x1x4x8xf32>,
    %142 = vector.extract_strided_slice %111 {offsets = [0, 40], sizes = [4, 8], strides = [1, 1]} : vector<4x78xf32> to vector<4x8xf32>
    %c0_117 = arith.constant 0 : index
    %c0_118 = arith.constant 0 : index
    %c0_119 = arith.constant 0 : index
    %c32 = arith.constant 32 : index
    %143 = vector.load %arg10[%c0_117, %c0_118, %c0_119, %c32] : memref<1x1x4x64xf32, #tpu.memory_space<vmem>>, vector<1x1x4x8xf32>
    %144 = vector.shape_cast %143 : vector<1x1x4x8xf32> to vector<4x8xf32>
    %145 = vector.shape_cast %142 : vector<4x8xf32> to vector<1x1x4x8xf32>
    tpu.vector_store %arg10[%c0_117, %c0_118, %c0_119, %c32], %145 {strides = array<i32>} : memref<1x1x4x64xf32, #tpu.memory_space<vmem>>, vector<1x1x4x8xf32>,
    %146 = vector.extract_strided_slice %111 {offsets = [0, 50], sizes = [4, 8], strides = [1, 1]} : vector<4x78xf32> to vector<4x8xf32>
    %c0_120 = arith.constant 0 : index
    %c0_121 = arith.constant 0 : index
    %c0_122 = arith.constant 0 : index
    %c40 = arith.constant 40 : index
    %147 = vector.load %arg10[%c0_120, %c0_121, %c0_122, %c40] : memref<1x1x4x64xf32, #tpu.memory_space<vmem>>, vector<1x1x4x8xf32>
    %148 = vector.shape_cast %147 : vector<1x1x4x8xf32> to vector<4x8xf32>
    %149 = vector.shape_cast %146 : vector<4x8xf32> to vector<1x1x4x8xf32>
    tpu.vector_store %arg10[%c0_120, %c0_121, %c0_122, %c40], %149 {strides = array<i32>} : memref<1x1x4x64xf32, #tpu.memory_space<vmem>>, vector<1x1x4x8xf32>,
    %150 = vector.extract_strided_slice %111 {offsets = [0, 60], sizes = [4, 8], strides = [1, 1]} : vector<4x78xf32> to vector<4x8xf32>
    %c0_123 = arith.constant 0 : index
    %c0_124 = arith.constant 0 : index
    %c0_125 = arith.constant 0 : index
    %c48 = arith.constant 48 : index
    %151 = vector.load %arg10[%c0_123, %c0_124, %c0_125, %c48] : memref<1x1x4x64xf32, #tpu.memory_space<vmem>>, vector<1x1x4x8xf32>
    %152 = vector.shape_cast %151 : vector<1x1x4x8xf32> to vector<4x8xf32>
    %153 = vector.shape_cast %150 : vector<4x8xf32> to vector<1x1x4x8xf32>
    tpu.vector_store %arg10[%c0_123, %c0_124, %c0_125, %c48], %153 {strides = array<i32>} : memref<1x1x4x64xf32, #tpu.memory_space<vmem>>, vector<1x1x4x8xf32>,
    %154 = vector.extract_strided_slice %111 {offsets = [0, 70], sizes = [4, 8], strides = [1, 1]} : vector<4x78xf32> to vector<4x8xf32>
    %c0_126 = arith.constant 0 : index
    %c0_127 = arith.constant 0 : index
    %c0_128 = arith.constant 0 : index
    %c56 = arith.constant 56 : index
    %155 = vector.load %arg10[%c0_126, %c0_127, %c0_128, %c56] : memref<1x1x4x64xf32, #tpu.memory_space<vmem>>, vector<1x1x4x8xf32>
    %156 = vector.shape_cast %155 : vector<1x1x4x8xf32> to vector<4x8xf32>
    %157 = vector.shape_cast %154 : vector<4x8xf32> to vector<1x1x4x8xf32>
    tpu.vector_store %arg10[%c0_126, %c0_127, %c0_128, %c56], %157 {strides = array<i32>} : memref<1x1x4x64xf32, #tpu.memory_space<vmem>>, vector<1x1x4x8xf32>,
    return
  }
  func.func @transform_0(%arg0: i32, %arg1: i32) -> (i32, i32, i32, i32) {
    %c1_i32 = arith.constant 1 : i32
    %0 = arith.subi %arg1, %c1_i32 : i32
    %c0_i32 = arith.constant 0 : i32
    %1 = arith.maxsi %0, %c0_i32 : i32
    %c0_i32_0 = arith.constant 0 : i32
    %c0_i32_1 = arith.constant 0 : i32
    %c0_i32_2 = arith.constant 0 : i32
    return %arg0, %1, %c0_i32_0, %c0_i32_1 : i32, i32, i32, i32
  }
  func.func @transform_1(%arg0: i32, %arg1: i32) -> (i32, i32, i32, i32) {
    %c0_i32 = arith.constant 0 : i32
    %c0_i32_0 = arith.constant 0 : i32
    %c0_i32_1 = arith.constant 0 : i32
    return %arg0, %arg1, %c0_i32, %c0_i32_0 : i32, i32, i32, i32
  }
  func.func @transform_2(%arg0: i32, %arg1: i32) -> (i32, i32, i32, i32) {
    %c1_i32 = arith.constant 1 : i32
    %0 = arith.addi %arg1, %c1_i32 : i32
    %c7_i32 = arith.constant 7 : i32
    %1 = arith.minsi %0, %c7_i32 : i32
    %c0_i32 = arith.constant 0 : i32
    %c0_i32_0 = arith.constant 0 : i32
    %c0_i32_1 = arith.constant 0 : i32
    return %arg0, %1, %c0_i32, %c0_i32_0 : i32, i32, i32, i32
  }
  func.func @transform_3(%arg0: i32, %arg1: i32) -> (i32, i32, i32) {
    %c0_i32 = arith.constant 0 : i32
    %c0_i32_0 = arith.constant 0 : i32
    %c0_i32_1 = arith.constant 0 : i32
    %c0_i32_2 = arith.constant 0 : i32
    return %c0_i32, %c0_i32_0, %c0_i32_1 : i32, i32, i32
  }
  func.func @transform_4(%arg0: i32, %arg1: i32) -> (i32, i32) {
    %c0_i32 = arith.constant 0 : i32
    %c0_i32_0 = arith.constant 0 : i32
    %c0_i32_1 = arith.constant 0 : i32
    return %c0_i32, %c0_i32_0 : i32, i32
  }
  func.func @transform_5(%arg0: i32, %arg1: i32) -> (i32, i32) {
    %c0_i32 = arith.constant 0 : i32
    %c0_i32_0 = arith.constant 0 : i32
    %c0_i32_1 = arith.constant 0 : i32
    return %c0_i32, %c0_i32_0 : i32, i32
  }
  func.func @transform_6(%arg0: i32, %arg1: i32) -> (i32, i32) {
    %c0_i32 = arith.constant 0 : i32
    %c0_i32_0 = arith.constant 0 : i32
    %c0_i32_1 = arith.constant 0 : i32
    return %c0_i32, %c0_i32_0 : i32, i32
  }
  func.func @transform_7(%arg0: i32, %arg1: i32) -> (i32, i32) {
    %c0_i32 = arith.constant 0 : i32
    %c0_i32_0 = arith.constant 0 : i32
    %c0_i32_1 = arith.constant 0 : i32
    return %c0_i32, %c0_i32_0 : i32, i32
  }
  func.func @transform_8(%arg0: i32, %arg1: i32) -> (i32, i32, i32, i32) {
    %c0_i32 = arith.constant 0 : i32
    %c0_i32_0 = arith.constant 0 : i32
    %c0_i32_1 = arith.constant 0 : i32
    return %arg0, %arg1, %c0_i32, %c0_i32_0 : i32, i32, i32, i32
  }
  func.func @transform_9(%arg0: i32, %arg1: i32) -> (i32, i32) {
    %c0_i32 = arith.constant 0 : i32
    %c0_i32_0 = arith.constant 0 : i32
    %c0_i32_1 = arith.constant 0 : i32
    return %c0_i32, %c0_i32_0 : i32, i32
  }
}

</mosaic_0001>

<bundles_post_ra>
// kernel: conv_res_block_3d.4
= control target key start
LH: loop header
LB: loop body
LE: loop exit
PB: predicated region body
PF: predicated region fallthrough
CT: control target
= control target key end

     0   :  { %s560_s12 = smov 0   ;;  %s562_s13 = smov 0   ;;  %s628_s0 = inlined_call_operand.vmem [shape: f32[2,8,4,64], index: 0, kind: input, shape index: {}]   ;;  %s629_s1 = inlined_call_operand.vmem [shape: f32[2,4], index: 1, kind: input, shape index: {}]   ;;  %s630_s2 = inlined_call_operand.vmem [shape: f32[2,1], index: 2, kind: input, shape index: {}]   ;;  %s631_s3 = inlined_call_operand.vmem [shape: f32[2,8,2,100], index: 3, kind: output, shape index: {}]  }
   0x1   :  { %s564_s14 = smov 0   ;;  %s566_s15 = smov 0  }
   0x2   :  { %s568_s16 = smov 0  }
   0x3 LB: > { %s22_s17 = sadd.s32 1, %s519_s14  ;;  %s25_s18 = sadd.s32 1, %s523_s15  ;;  %s527_s16 = sphi %s568_s16, %s13_s16   ;;  %s523_s15 = sphi %s566_s15, %s635_s15   ;;  %s519_s14 = sphi %s564_s14, %s634_s14   ;;  %s515_s13 = sphi %s562_s13, %s633_s13   ;;  %s511_s12 = sphi %s560_s12, %s632_s12  }
   0x4   : > { %p23_p0 = scmp.ge.s32.totalorder %s22_s17, 8  ;;  %p421_p1 = scmp.ge.s32.totalorder %s527_s16, 1 }
   0x5   : > { %p156_p2 = scmp.lt.s32.totalorder %s527_s16, 17 }
   0x6   : > { %s637_s17 = smov (%p23_p0, %s22_s17), 0  ;;  %s639_s18 = smov (!%p23_p0, %s25_s18), %s523_s15 }
   0x7   : > { %p157_p3 = pnand %p421_p1, %p156_p2  ;;  %p27_p4 = scmp.ge.s32.totalorder %s639_s18, 2 }
   0x8   : > { %p186_p5 = scmp.lt.s32.totalorder (!%p157_p3), %s515_s13, 1  ;;  %p188_p6 = scmp.lt.s32.totalorder (!%p157_p3), %s511_s12, 7 }
   0x9   : > { %s641_s18 = smov (%p27_p4, %s639_s18), 0  ;;  %160 = sbr.rel (%p157_p3) target bundleno = 345 (0x159), region = 32 }
   0xa   : > { %s532_s6 = smov (!%p157_p3), 13   ;;  %s533_s7 = smov (!%p157_p3), 11  }
   0xb   : > { %s534_s8 = smov (!%p157_p3), 15   ;;  %s535_s9 = smov (!%p157_p3), 17  }
   0xc   : > { %s536_s10 = smov (!%p157_p3), 19   ;;  %s537_s11 = smov (!%p157_p3), 21  }
   0xe   : > { %v529_v0 = vmov 0.0   ;;  %vm530_vm0 = vmmov 0   ;;  %v204_v1 = vld [vmem:[%s630_s2] sm:$0x3]  ;;  %s643_s13 = smov (!%p186_p5, %s515_s13), 1  ;;  %v531_v2 = vmov 0  }
   0xf   : > { %432 = vmatprep.subr.mxu0 %v529_v0  ;;  %434 = vmatprep.mubr.msk.f32.mxu0 %vm530_vm0, %v529_v0  ;;  %s645_s12 = smov (!%p188_p6, %s511_s12), 7  ;;  %s422_s21 = sshll.u32 %s643_s13, 3  ;;  %vm214_vm1 = vcmask 1043456   ;;  %v202_v3 = vld [vmem:[%s629_s1] sm:$0x3]  ;;  %vm210_vm2 = vcmask 31744  }
  0x10   : > { %488 = vset.pattern.permute.xlu0 %v531_v2  ;;  %s191_s22 = sadd.s32 %s422_s21, %s645_s12  ;;  %vm288_vm3 = vcmask 812032   ;;  %s538_s12 = smov 23   ;;  %vm294_vm4 = vcmask 148568   ;;  %vm299_vm5 = vcmask 230568   ;;  %vm304_vm6 = vcmask 312568  }
  0x11   : > { %207 = vperm.xlu0 %488, %v204_v1   ;;  %s423_s23 = sshll.u32 %s191_s22, 2  ;;  %s425_s29 = sshll.u32 %s191_s22, 1  ;;  %vm309_vm7 = vcmask 394568   ;;  %vm314_vm8 = vcmask 476568   ;;  %vm319_vm9 = vcmask 558568   ;;  %vm324_vm10 = vcmask 640568  }
  0x12   : > { %s193_s26 = scalar_lea.vmem %s628_s0, %s423_s23  ;;  %s602_s5 = scalar_lea.vmem %s631_s3, %s425_s29  ;;  %vm329_vm11 = vcmask 722568  }
  0x13   : > { %v203_v4 = vld [vmem:[%s193_s26] sm:$0xf]  ;;  %289 = vst.msk [vmem:[%s602_s5] sm:$0x3] %vm288_vm3, %v529_v0  ;;  %s539_s13 = smov 25  }
  0x14   : > { %433 = vmatpush3.msk.msra.mxu0 %vm214_vm1, %v203_v4 }
  0x15   : > { %435 = vmatmul.mubr.msk.f32.vlgmr.msra.gmra.mxu0 %vm210_vm2, %v202_v3 }
  0x8c   : > { %v208_v5 = vpop.permute.xlu0 %207 }
  0xd5   : > { %v284_v6 = vpop.f32.mrf.mxu0 }
  0xd6   : > { %v285_v7 = vadd.f32 %v284_v6, %v208_v5 }
  0xd7   : > { %v436_v8 = vpop.f32.mrf.mxu0 }
  0xd8   : > { %296 = vrot.lane.b32.xlu1 %v285_v7, %s532_s6  ;;  %291 = vrot.lane.b32.xlu0 %v285_v7, %s533_s7 }
  0xdc   : > { %301 = vrot.lane.b32.xlu1 %v285_v7, %s534_s8  ;;  %306 = vrot.lane.b32.xlu0 %v285_v7, %s535_s9 }
  0xe0   : > { %311 = vrot.lane.b32.xlu1 %v285_v7, %s536_s10  ;;  %316 = vrot.lane.b32.xlu0 %v285_v7, %s537_s11 }
  0xe4   : > { %321 = vrot.lane.b32.xlu1 %v285_v7, %s538_s12  ;;  %326 = vrot.lane.b32.xlu0 %v285_v7, %s539_s13 }
 0x14a   : > { %v297_v9 = vpop.permute.xlu1 %296  ;;  %v292_v10 = vpop.permute.xlu0 %291 }
 0x14b   : > { %295 = vst.msk [vmem:[%s602_s5] sm:$0x3] %vm294_vm4, %v292_v10 }
 0x14c   : > { %300 = vst.msk [vmem:[%s602_s5] sm:$0x3] %vm299_vm5, %v297_v9 }
 0x14e   : > { %v302_v11 = vpop.permute.xlu1 %301  ;;  %v307_v12 = vpop.permute.xlu0 %306 }
 0x14f   : > { %305 = vst.msk [vmem:[%s602_s5] sm:$0x3] %vm304_vm6, %v302_v11 }
 0x150   : > { %310 = vst.msk [vmem:[%s602_s5] sm:$0x3] %vm309_vm7, %v307_v12 }
 0x152   : > { %v312_v13 = vpop.permute.xlu1 %311  ;;  %v317_v14 = vpop.permute.xlu0 %316 }
 0x153   : > { %315 = vst.msk [vmem:[%s602_s5] sm:$0x3] %vm314_vm8, %v312_v13 }
 0x154   : > { %320 = vst.msk [vmem:[%s602_s5] sm:$0x3] %vm319_vm9, %v317_v14 }
 0x156   : > { %v322_v15 = vpop.permute.xlu1 %321  ;;  %v327_v16 = vpop.permute.xlu0 %326 }
 0x157   : > { %325 = vst.msk [vmem:[%s602_s5] sm:$0x3] %vm324_vm10, %v322_v15 }
 0x158   : > { %330 = vst.msk [vmem:[%s602_s5] sm:$0x3] %vm329_vm11, %v327_v16 }
 0x159 PF: > { %s13_s16 = sadd.s32 1, %s527_s16   ;;  %s632_s12 = smov %s519_s14 }
 0x15a   : > { %p10_p7 = scmp.ge.s32.totalorder %s13_s16, 18   ;;  %s633_s13 = smov %s523_s15 }
 0x15b   : > { %s634_s14 = smov %s637_s17  ;;  %s635_s15 = smov %s641_s18 }
 0x15c   :  { %12 = sbr.rel (!%p10_p7) target bundleno = 3 (0x3), region = 62 }

// kernel: conv_res_block_3d.7
= control target key start
LH: loop header
LB: loop body
LE: loop exit
PB: predicated region body
PF: predicated region fallthrough
CT: control target
= control target key end

     0   :  { %s825_s27 = smov 0   ;;  %s827_s28 = smov 0   ;;  %s905_s0 = inlined_call_operand.vmem [shape: f32[2,8,4,64], index: 0, kind: input, shape index: {}]   ;;  %s906_s1 = inlined_call_operand.vmem [shape: f32[2,8,4,64], index: 1, kind: input, shape index: {}]   ;;  %s907_s2 = inlined_call_operand.vmem [shape: f32[4,1], index: 2, kind: input, shape index: {}]   ;;  %s908_s3 = inlined_call_operand.vmem [shape: f32[4,1], index: 3, kind: input, shape index: {}]   ;;  %s909_s4 = inlined_call_operand.vmem [shape: f32[8,4], index: 4, kind: input, shape index: {}]   ;;  %s910_s5 = inlined_call_operand.vmem [shape: f32[8,1], index: 5, kind: input, shape index: {}]   ;;  %s911_s6 = inlined_call_operand.vmem [shape: f32[8,4], index: 6, kind: input, shape index: {}]   ;;  %s912_s7 = inlined_call_operand.vmem [shape: f32[8,1], index: 7, kind: input, shape index: {}]   ;;  %s913_s8 = inlined_call_operand.vmem [shape: f32[2,8,8,64], index: 8, kind: output, shape index: {}]  }
   0x1   :  { %s829_s29 = smov 0   ;;  %s831_s30 = smov 0  }
   0x2   :  { %s833_s9 = smov 0  }
   0x3 LB: > { %s27_s10 = sadd.s32 1, %s767_s29  ;;  %s30_s11 = sadd.s32 1, %s771_s30  ;;  %s775_s9 = sphi %s833_s9, %s18_s9   ;;  %s771_s30 = sphi %s831_s30, %s917_s30   ;;  %s767_s29 = sphi %s829_s29, %s916_s29   ;;  %s763_s28 = sphi %s827_s28, %s915_s28   ;;  %s759_s27 = sphi %s825_s27, %s914_s27  }
   0x4   : > { %p28_p0 = scmp.ge.s32.totalorder %s27_s10, 8  ;;  %p665_p1 = scmp.ge.s32.totalorder %s775_s9, 1 }
   0x5   : > { %p296_p2 = scmp.lt.s32.totalorder %s775_s9, 17 }
   0x6   : > { %s919_s10 = smov (%p28_p0, %s27_s10), 0  ;;  %s921_s11 = smov (!%p28_p0, %s30_s11), %s771_s30 }
   0x7   : > { %p297_p3 = pnand %p665_p1, %p296_p2  ;;  %p32_p4 = scmp.ge.s32.totalorder %s921_s11, 2 }
   0x8   : > { %p344_p5 = scmp.lt.s32.totalorder (!%p297_p3), %s763_s28, 1  ;;  %p346_p6 = scmp.lt.s32.totalorder (!%p297_p3), %s759_s27, 7 }
   0x9   : > { %s923_s11 = smov (%p32_p4, %s921_s11), 0  ;;  %300 = sbr.rel (%p297_p3) target bundleno = 349 (0x15d), region = 52 }
   0xe   : > { %v369_v0 = vld [vmem:[%s907_s2] sm:$0xf]  ;;  %v777_v1 = vmov 0   ;;  %s925_s28 = smov (!%p344_p5, %s763_s28), 1  ;;  %s927_s27 = smov (!%p346_p6, %s759_s27), 7  ;;  %v778_v3 = vmov 0.0  }
   0xf   : > { %735 = vset.pattern.permute.xlu0 %v777_v1  ;;  %736 = vset.pattern.permute.xlu1 %v777_v1  ;;  %v376_v2 = vld [vmem:[%s908_s3] sm:$0xf]  ;;  %s666_s16 = sshll.u32 %s925_s28, 3  ;;  %vm779_vm0 = vmmov 0   ;;  %vm395_vm1 = vcmask 1043456   ;;  %vm391_vm2 = vcmask 31744  }
  0x10   : > { %372 = vperm.xlu0 %735, %v369_v0   ;;  %s861_s17 = sadd.s32 %s666_s16, %s927_s27  ;;  %682 = vmatprep.subr.mxu0 %v778_v3  ;;  %v385_v4 = vld [vmem:[%s910_s5] sm:$0xff]  ;;  %vm555_vm3 = vcmask 523264  }
  0x11   : > { %687 = vmatprep.subr.mxu1 %v778_v3  ;;  %684 = vmatprep.mubr.msk.f32.mxu0 %vm779_vm0, %v778_v3  ;;  %s667_s18 = sshll.u32 %s861_s17, 2  ;;  %v469_v5 = vld [vmem:[%s911_s6] sm:$0xff]  ;;  %s671_s16 = sshll.u32 %s861_s17, 3 }
  0x12   : > { %689 = vmatprep.mubr.msk.f32.mxu1 %vm779_vm0, %v778_v3  ;;  %s359_s23 = scalar_lea.vmem %s906_s1, %s667_s18  ;;  %388 = vperm.xlu1 %736, %v385_v4   ;;  %v548_v7 = vld [vmem:[%s912_s7] sm:$0xff]  ;;  %s351_s13 = scalar_lea.vmem %s905_s0, %s667_s18 }
  0x13   : > { %v470_v6 = vld [vmem:[%s359_s23] sm:$0xf]  ;;  %s367_s20 = scalar_lea.vmem %s913_s8, %s671_s16 }
  0x14   : > { %379 = vperm.xlu0 %735, %v376_v2   ;;  %688 = vmatpush3.msk.msra.mxu1 %vm395_vm1, %v470_v6  ;;  %v368_v9 = vld [vmem:[%s351_s13] sm:$0xf] }
  0x15   : > { %690 = vmatmul.mubr.msk.f32.vlgmr.msra.gmra.mxu1 %vm391_vm2, %v469_v5  ;;  %v384_v14 = vld [vmem:[%s909_s4] sm:$0xff] }
  0x16   : > { %551 = vperm.xlu1 %736, %v548_v7  }
  0x8b   : > { %v373_v8 = vpop.permute.xlu0 %372 }
  0x8c   : > { %v375_v10 = vmul.f32 %v373_v8, %v368_v9 }
  0x8d   : > { %v389_v17 = vpop.permute.xlu1 %388 }
  0x8f   : > { %v380_v11 = vpop.permute.xlu0 %379 }
  0x90   : > { %v382_v12 = vadd.f32 %v380_v11, %v375_v10 }
  0x91   : > { %v552_v22 = vpop.permute.xlu1 %551 }
  0x92   : > { %v383_v13 = vmax.f32 %v382_v12, 0.0 }
  0x94   : > { %683 = vmatpush3.msk.msra.mxu0 %vm395_vm1, %v383_v13 }
  0x95   : > { %685 = vmatmul.mubr.msk.f32.vlgmr.msra.gmra.mxu0 %vm391_vm2, %v384_v14 }
  0xd5   : > { %v543_v15 = vpop.f32.mrf.mxu1 }
  0xd7   : > { %v691_v16 = vpop.f32.mrf.mxu1 }
 0x155   : > { %v465_v18 = vpop.f32.mrf.mxu0 }
 0x156   : > { %v466_v19 = vadd.f32 %v465_v18, %v389_v17 }
 0x157   : > { %v686_v20 = vpop.f32.mrf.mxu0 }
 0x158   : > { %v547_v21 = vadd.f32 %v543_v15, %v466_v19 }
 0x15a   : > { %v554_v23 = vadd.f32 %v552_v22, %v547_v21 }
 0x15c   : > { %556 = vst.msk [vmem:[%s367_s20] sm:$0xff] %vm555_vm3, %v554_v23 }
 0x15d PF: > { %s18_s9 = sadd.s32 1, %s775_s9   ;;  %s914_s27 = smov %s767_s29 }
 0x15e   : > { %p15_p7 = scmp.ge.s32.totalorder %s18_s9, 18   ;;  %s915_s28 = smov %s771_s30 }
 0x15f   : > { %s916_s29 = smov %s919_s10  ;;  %s917_s30 = smov %s923_s11 }
 0x160   :  { %17 = sbr.rel (!%p15_p7) target bundleno = 3 (0x3), region = 85 }

// kernel: conv_res_block_3d.5
= control target key start
LH: loop header
LB: loop body
LE: loop exit
PB: predicated region body
PF: predicated region fallthrough
CT: control target
= control target key end

     0   :  { %s1677_s30 = smov 0   ;;  %s1679_s10 = smov 0   ;;  %s1875_s0 = inlined_call_operand.vmem [shape: f32[2,8,2,100], index: 0, kind: input, shape index: {}, may-alias: {0,1,2}]   ;;  %s1876_s1 = inlined_call_operand.vmem [shape: f32[2,8,2,100], index: 1, kind: input, shape index: {}, may-alias: {0,1,2}]   ;;  %s1877_s2 = inlined_call_operand.vmem [shape: f32[2,8,2,100], index: 2, kind: input, shape index: {}, may-alias: {0,1,2}]   ;;  %s1878_s3 = inlined_call_operand.vmem [shape: f32[9,4,6], index: 3, kind: input, shape index: {}]   ;;  %s1879_s4 = inlined_call_operand.vmem [shape: f32[4,1], index: 4, kind: input, shape index: {}]   ;;  %s1880_s5 = inlined_call_operand.vmem [shape: f32[2,1], index: 5, kind: input, shape index: {}]   ;;  %s1881_s6 = inlined_call_operand.vmem [shape: f32[2,1], index: 6, kind: input, shape index: {}]   ;;  %s1882_s7 = inlined_call_operand.vmem [shape: f32[1,100], index: 7, kind: input, shape index: {}]   ;;  %s1883_s8 = inlined_call_operand.vmem [shape: f32[2,8,4,100], index: 8, kind: output, shape index: {0}]   ;;  %s1884_s9 = inlined_call_operand.vmem [shape: f32[4,2], index: 9, kind: output, shape index: {1}]  }
   0x1   :  { %s1681_s11 = smov 0   ;;  %s1683_s12 = smov 0  }
   0x2   :  { %s1685_s5 = smov 0  }
   0x3 LB: > { %1886 = sst [smem:[#allocation3_spill]] %s1608_s12  ;;  %s29_s6 = sadd.s32 1, %s1604_s11  ;;  %s1612_s5 = sphi %s1685_s5, %s20_s5   ;;  %s1608_s12 = sphi %s1683_s12, %s1892_s12   ;;  %s1604_s11 = sphi %s1681_s11, %s1894_s11   ;;  %s1600_s10 = sphi %s1679_s10, %s1890_s10   ;;  %s1596_s30 = sphi %s1677_s30, %s1893_s30  }
   0x4   : > { %s32_s13 = sadd.s32 1, %s1608_s12  ;;  %p30_p0 = scmp.ge.s32.totalorder %s29_s6, 8 }
   0x5   : > { %p1405_p1 = scmp.ge.s32.totalorder %s1612_s5, 1  ;;  %p358_p2 = scmp.lt.s32.totalorder %s1612_s5, 17 }
   0x6   : > { %s1896_s6 = smov (%p30_p0, %s29_s6), 0  ;;  %s1898_s13 = smov (!%p30_p0, %s32_s13), %s1608_s12 }
   0x7   : > { %1887 = sst [smem:[#allocation4_spill]] %s1896_s6  ;;  %p359_p3 = pnand %p1405_p1, %p358_p2 }
   0x8   : > { %p34_p4 = scmp.ge.s32.totalorder %s1898_s13, 2  ;;  %s1712_s14 = sadd.s32 (!%p359_p3), 4294967295, %s1596_s30 }
   0x9   : > { %362 = sbr.rel (%p359_p3) target bundleno = 534 (0x216), region = 52  ;;  %p425_p5 = scmp.lt.s32.totalorder (!%p359_p3), %s1600_s10, 1 }
   0xa   : > { %s1900_s13 = smov (%p34_p4, %s1898_s13), 0  ;;  %p423_p6 = scmp.gt.s32.totalorder (!%p359_p3), %s1712_s14, 0 }
   0xb   : > { %1888 = sst [smem:[#allocation5_spill]] %s1900_s13  ;;  %p1407_p7 = scmp.lt.s32.totalorder (!%p359_p3), %s1712_s14, 7 }
   0xc   : > { %p438_p8 = scmp.lt.s32.totalorder (!%p359_p3), %s1596_s30, 7  ;;  %s1722_s20 = sadd.s32 (!%p359_p3), 1, %s1596_s30 }
   0xd   : > { %p445_p9 = scmp.lt.s32.totalorder (!%p359_p3), %s1722_s20, 7  ;;  %p466_p10 = scmp.eq.s32.totalorder (!%p359_p3), %s1600_s10, 0 }
   0xe   : > { %s426_s15 = scalar_select %p425_p5, %s1600_s10, 1 }
   0xf   : > { %s424_s16 = scalar_select %p423_p6, %s1712_s14, 0 }
  0x10   : > { %s1412_s17 = sshll.u32 %s426_s15, 3  ;;  %p467_p11 = scmp.eq.s32.totalorder %s1596_s30, 0 }
  0x11   : > { %s1902_s16 = smov (!%p1407_p7, %s424_s16), 7 }
  0x12   : > { %s439_s18 = scalar_select %p438_p8, %s1596_s30, 7 }
  0x13   : > { %s430_s19 = sadd.s32 %s1902_s16, %s1412_s17  ;;  %p468_p12 = pnand %p467_p11, %p466_p10 }
  0x14   : > { %s1724_s21 = sshll.u32 %s430_s19, 1  ;;  %s441_s22 = sadd.s32 %s1412_s17, %s439_s18 }
  0x15   : > { %s1415_s26 = sshll.u32 %s441_s22, 1  ;;  %s1422_s15 = sshll.u32 %s441_s22, 2 }
  0x16   : > { %s443_s29 = scalar_lea.vmem %s1876_s1, %s1415_s26  ;;  %s1739_s19 = scalar_lea.vmem %s1883_s8, %s1422_s15 }
  0x17   : > { %s446_s16 = scalar_select %p445_p9, %s1722_s20, 7 }
  0x18   : > { %471 = sbr.rel (%p468_p12) target bundleno = 31 (0x1f), region = 56 }
  0x19   : > { %s1904_s16 = smov (!%p445_p9, %s446_s16), 7 }
  0x1a   : > { %s452_s18 = sadd.s32 %s1412_s17, %s1904_s16 }
  0x1b   : > { %s1420_s23 = sshll.u32 %s452_s18, 1 }
  0x1c   : > { %s454_s12 = scalar_lea.vmem %s1877_s2, %s1420_s23 }
  0x1d   : > { %vm472_vm0 = vcmask 11264   ;;  %v1614_v0 = vmov 0.0  }
  0x1e   : > { %473 = vst.msk [vmem:[%s1884_s9] sm:$0xf] %vm472_vm0, %v1614_v0 }
  0x1f PF: > { %p476_p13 = scmp.ge.s32.totalorder %s1712_s14, 0  ;;  %p477_p0 = scmp.lt.s32.totalorder %s1712_s14, 8  ;;  %vm483_vm1 = vcmask 812032   ;;  %v485_v1 = vld [vmem:[%s443_s29] sm:$0x3]  ;;  %v1615_v2 = vmov 0.0  }
  0x20   : > { %p489_p1 = scmp.ge.s32.totalorder %s1722_s20, 0  ;;  %p490_p2 = scmp.lt.s32.totalorder %s1722_s20, 8  ;;  %1475 = vmatprep.subr.mxu0 %v1615_v2  ;;  %1480 = vmatprep.subr.mxu1 %v1615_v2  ;;  %486 = vst.msk [vmem:[#allocation2 + $0x2] sm:$0x3] %vm483_vm1, %v485_v1  ;;  %v487_v4 = vld [vmem:[%s454_s12] sm:$0x3] }
  0x21   : > { %p478_p3 = pnand %p477_p0, %p476_p13  ;;  %s1889_s13 = scalar_lea.vmem %s1875_s0, %s1724_s21  ;;  %vm1616_vm2 = vmmov 0   ;;  %vm508_vm3 = vcmask 1045504   ;;  %vm504_vm4 = vcmask 48128   ;;  %v498_v10 = vld [vmem:[%s1878_s3] sm:$0xf]  ;;  %v1621_v11 = vmov 0  }
  0x22   : > { %p491_p4 = pnand %p490_p2, %p489_p1  ;;  %v474_v3 = vld [vmem:[%s1889_s13] sm:$0x3]  ;;  %1477 = vmatprep.mubr.msk.f32.mxu0 %vm1616_vm2, %v1615_v2  ;;  %1482 = vmatprep.mubr.msk.f32.mxu1 %vm1616_vm2, %v1615_v2  ;;  %s1617_s21 = smov 127   ;;  %v1426_v14 = vld [vmem:[%s1878_s3 + $0x4] sm:$0xf]  ;;  %vm1234_vm5 = vcmask 633856  }
  0x23   : > { %s1424_s17 = scalar_select %p478_p3, 0.0, 1.0  ;;  %1573 = vset.pattern.permute.xlu0 %v1621_v11  ;;  %v1216_v12 = vld [vmem:[%s1879_s4] sm:$0xf]  ;;  %v1434_v17 = vld [vmem:[%s1878_s3 + $0xc] sm:$0xf] }
  0x24   : > { %s1425_s14 = scalar_select %p491_p4, 0.0, 1.0  ;;  %v1452_v13 = vld [vmem:[%s1882_s7] ss:$0 sm:$0xff]  ;;  %v1431_v18 = vld [vmem:[%s1878_s3 + $0x8] sm:$0xf] }
  0x25   : > { %v481_v5 = vstv %s1424_s17  ;;  %s1618_s25 = smov 118   ;;  %s1619_s26 = smov 126   ;;  %v1437_v21 = vld [vmem:[%s1878_s3 + $0x10] sm:$0xf]  ;;  %v1440_v22 = vld [vmem:[%s1878_s3 + $0x14] sm:$0xf] }
  0x26   : > { %v482_v6 = vmul.f32 %v481_v5, %v474_v3  ;;  %v494_v7 = vstv %s1425_s14  ;;  %s1620_s27 = smov 117   ;;  %s1622_s28 = smov 116   ;;  %v1443_v25 = vld [vmem:[%s1878_s3 + $0x18] sm:$0xf]  ;;  %v1446_v26 = vld [vmem:[%s1878_s3 + $0x1c] sm:$0xf] }
  0x27   : > { %v495_v8 = vmul.f32 %v494_v7, %v487_v4  ;;  %s1623_s29 = smov 108   ;;  %s1624_s15 = smov 107   ;;  %v1449_v29 = vld [vmem:[%s1878_s3 + $0x20] sm:$0xf]  ;;  %vm1249_vm6 = vcmask 814080   ;;  %vm1239_vm7 = vcmask 3072  }
  0x28   : > { %484 = vst.msk [vmem:[#allocation2] sm:$0x3] %vm483_vm1, %v482_v6  ;;  %s1625_s16 = smov 106   ;;  %s1626_s18 = smov 11   ;;  %v1233_v63 = vld [vmem:[%s1884_s9] sm:$0xf] }
  0x29   : > { %496 = vst.msk [vmem:[#allocation2 + $0x4] sm:$0x3] %vm483_vm1, %v495_v8  ;;  %vm1255_vm8 = vcmask 150616   ;;  %vm1257_vm9 = vcmask 232616   ;;  %vm1259_vm10 = vcmask 314616   ;;  %vm1261_vm11 = vcmask 396616  }
  0x2a   : > { %1250 = vst.msk [vmem:[%s1739_s19] sm:$0xf] %vm1249_vm6, %v1615_v2  ;;  %vm1263_vm12 = vcmask 478616   ;;  %vm1265_vm13 = vcmask 560616   ;;  %vm1247_vm14 = vcmask 11272   ;;  %vm1267_vm15 = vcmask 642616  }
  0x2b   : > { %vm1269_vm0 = vcmask 724616  }
  0x30   : > { %v497_v9 = vld [vmem:[#allocation2] sm:$0x3f] }
  0x31   : > { %502 = vrot.lane.b32.xlu0 %v497_v9, %s1617_s21  ;;  %738 = vrot.lane.b32.xlu1 %v497_v9, %s1618_s25 }
  0x32   : > { %1481 = vmatpush3.msk.msra.mxu1 %vm508_vm3, %v497_v9 }
  0x33   : > { %1483 = vmatmul.mubr.msk.f32.vlgmr.msra.gmra.mxu1 %vm504_vm4, %v498_v10  ;;  %1490 = vmatprep.subr.mxu1 %v1615_v2 }
  0x34   : > { %1492 = vmatprep.mubr.msk.f32.mxu1 %vm1616_vm2, %v1615_v2 }
  0x35   : > { %658 = vrot.lane.b32.xlu0 %v497_v9, %s1619_s26  ;;  %818 = vrot.lane.b32.xlu1 %v497_v9, %s1620_s27 }
  0x39   : > { %898 = vrot.lane.b32.xlu0 %v497_v9, %s1622_s28  ;;  %978 = vrot.lane.b32.xlu1 %v497_v9, %s1623_s29 }
  0x3d   : > { %1058 = vrot.lane.b32.xlu0 %v497_v9, %s1624_s15  ;;  %1138 = vrot.lane.b32.xlu1 %v497_v9, %s1625_s16 }
  0x41   : > { %1219 = vperm.xlu0 %1573, %v1216_v12   ;;  %1229 = vrot.lane.b32.xlu1 %v1452_v13, %s1620_s27 }
  0xa3   : > { %v503_v15 = vpop.permute.xlu0 %502  ;;  %v739_v16 = vpop.permute.xlu1 %738 }
  0xa4   : > { %1476 = vmatpush3.msk.msra.mxu0 %vm508_vm3, %v503_v15  ;;  %1491 = vmatpush3.msk.msra.mxu1 %vm508_vm3, %v739_v16 }
  0xa5   : > { %1478 = vmatmul.mubr.msk.f32.vlgmr.msra.gmra.mxu0 %vm504_vm4, %v1426_v14  ;;  %1485 = vmatprep.subr.mxu0 %v1615_v2 }
  0xa6   : > { %1487 = vmatprep.mubr.msk.f32.mxu0 %vm1616_vm2, %v1615_v2  ;;  %1493 = vmatmul.mubr.msk.f32.vlgmr.msra.gmra.mxu1 %vm504_vm4, %v1434_v17 }
  0xa7   : > { %v659_v19 = vpop.permute.xlu0 %658  ;;  %v819_v20 = vpop.permute.xlu1 %818  ;;  %1500 = vmatprep.subr.mxu1 %v1615_v2  ;;  %1502 = vmatprep.mubr.msk.f32.mxu1 %vm1616_vm2, %v1615_v2 }
  0xa8   : > { %1486 = vmatpush3.msk.msra.mxu0 %vm508_vm3, %v659_v19 }
  0xa9   : > { %1488 = vmatmul.mubr.msk.f32.vlgmr.msra.gmra.mxu0 %vm504_vm4, %v1431_v18  ;;  %1495 = vmatprep.subr.mxu0 %v1615_v2 }
  0xaa   : > { %1496 = vmatpush3.msk.msra.mxu0 %vm508_vm3, %v819_v20  ;;  %1497 = vmatprep.mubr.msk.f32.mxu0 %vm1616_vm2, %v1615_v2 }
  0xab   : > { %v899_v23 = vpop.permute.xlu0 %898  ;;  %v979_v24 = vpop.permute.xlu1 %978  ;;  %1505 = vmatprep.subr.mxu0 %v1615_v2 }
  0xac   : > { %1501 = vmatpush3.msk.msra.mxu1 %vm508_vm3, %v899_v23 }
  0xad   : > { %1498 = vmatmul.mubr.msk.f32.vlgmr.msra.gmra.mxu0 %vm504_vm4, %v1437_v21  ;;  %1503 = vmatmul.mubr.msk.f32.vlgmr.msra.gmra.mxu1 %vm504_vm4, %v1440_v22 }
  0xae   : > { %1506 = vmatpush3.msk.msra.mxu0 %vm508_vm3, %v979_v24  ;;  %1507 = vmatprep.mubr.msk.f32.mxu0 %vm1616_vm2, %v1615_v2 }
  0xaf   : > { %v1059_v27 = vpop.permute.xlu0 %1058  ;;  %1510 = vmatprep.subr.mxu1 %v1615_v2  ;;  %1512 = vmatprep.mubr.msk.f32.mxu1 %vm1616_vm2, %v1615_v2  ;;  %v1139_v28 = vpop.permute.xlu1 %1138 }
  0xb0   : > { %1511 = vmatpush3.msk.msra.mxu1 %vm508_vm3, %v1059_v27  ;;  %1515 = vmatprep.subr.mxu0 %v1615_v2 }
  0xb1   : > { %1508 = vmatmul.mubr.msk.f32.vlgmr.msra.gmra.mxu0 %vm504_vm4, %v1443_v25  ;;  %1513 = vmatmul.mubr.msk.f32.vlgmr.msra.gmra.mxu1 %vm504_vm4, %v1446_v26 }
  0xb2   : > { %1516 = vmatpush3.msk.msra.mxu0 %vm508_vm3, %v1139_v28  ;;  %1517 = vmatprep.mubr.msk.f32.mxu0 %vm1616_vm2, %v1615_v2 }
  0xb3   : > { %v1230_v57 = vpop.permute.xlu1 %1229 }
  0xb5   : > { %1518 = vmatmul.mubr.msk.f32.vlgmr.msra.gmra.mxu0 %vm504_vm4, %v1449_v29 }
  0xbc   : > { %v1220_v54 = vpop.permute.xlu0 %1219 }
  0xf3   : > { %v652_v30 = vpop.f32.mrf.mxu1 }
  0xf5   : > { %v1484_v31 = vpop.f32.mrf.mxu1 }
 0x165   : > { %v577_v32 = vpop.f32.mrf.mxu0 }
 0x166   : > { %v811_v33 = vpop.f32.mrf.mxu1  ;;  %v653_v35 = vadd.f32 %v652_v30, %v577_v32 }
 0x167   : > { %v1479_v34 = vpop.f32.mrf.mxu0 }
 0x168   : > { %v1494_v36 = vpop.f32.mrf.mxu1 }
 0x169   : > { %v731_v37 = vpop.f32.mrf.mxu0 }
 0x16a   : > { %v735_v38 = vadd.f32 %v731_v37, %v653_v35 }
 0x16b   : > { %v1489_v39 = vpop.f32.mrf.mxu0 }
 0x16c   : > { %v815_v40 = vadd.f32 %v811_v33, %v735_v38 }
 0x16d   : > { %v891_v41 = vpop.f32.mrf.mxu0  ;;  %v971_v42 = vpop.f32.mrf.mxu1 }
 0x16e   : > { %v895_v43 = vadd.f32 %v891_v41, %v815_v40 }
 0x16f   : > { %v1499_v44 = vpop.f32.mrf.mxu0  ;;  %v1504_v45 = vpop.f32.mrf.mxu1 }
 0x170   : > { %v975_v46 = vadd.f32 %v971_v42, %v895_v43 }
 0x171   : > { %v1051_v47 = vpop.f32.mrf.mxu0  ;;  %v1131_v48 = vpop.f32.mrf.mxu1 }
 0x172   : > { %v1055_v49 = vadd.f32 %v1051_v47, %v975_v46 }
 0x173   : > { %v1509_v50 = vpop.f32.mrf.mxu0  ;;  %v1514_v51 = vpop.f32.mrf.mxu1 }
 0x174   : > { %v1135_v52 = vadd.f32 %v1131_v48, %v1055_v49 }
 0x175   : > { %v1211_v53 = vpop.f32.mrf.mxu0 }
 0x176   : > { %v1215_v55 = vadd.f32 %v1211_v53, %v1135_v52 }
 0x177   : > { %v1519_v56 = vpop.f32.mrf.mxu0 }
 0x178   : > { %v1222_v58 = vadd.f32 %v1220_v54, %v1215_v55 }
 0x17a   : > { %v1232_v59 = vmul.f32 %v1230_v57, %v1222_v58 }
 0x17c   : > { %v1235_v60 = vsel %vm1234_vm5, %v1232_v59, 0.0  ;;  %v1242_v61 = vmul.f32 %v1232_v59, %v1222_v58 }
 0x17d   : > { %1236 = vadd.xlane.f32.xlu1 %v1235_v60 }
 0x17e   : > { %v1243_v62 = vsel %vm1234_vm5, %v1242_v61, 0.0 }
 0x17f   : > { %1244 = vadd.xlane.f32.xlu0 %v1243_v62 }
 0x195   : > { %1252 = vrot.lane.b32.xlu0 %v1222_v58, %s1626_s18 }
 0x206   : > { %v1237_v0 = vpop.xlane.xlu1 %1236 }
 0x207   : > { %v1238_v1 = vadd.f32 %v1237_v0, %v1233_v63 }
 0x208   : > { %v1245_v3 = vpop.xlane.xlu0 %1244 }
 0x209   : > { %1240 = vst.msk [vmem:[%s1884_s9] sm:$0xf] %vm1239_vm7, %v1238_v1 }
 0x20c   : > { %v1253_v2 = vpop.permute.xlu0 %1252 }
 0x20d   : > { %1256 = vst.msk [vmem:[%s1739_s19] sm:$0xf] %vm1255_vm8, %v1253_v2 }
 0x20e   : > { %1258 = vst.msk [vmem:[%s1739_s19] sm:$0xf] %vm1257_vm9, %v1253_v2 }
 0x20f   : > { %1260 = vst.msk [vmem:[%s1739_s19] sm:$0xf] %vm1259_vm10, %v1253_v2 }
 0x210   : > { %v1241_v4 = vld [vmem:[%s1884_s9] sm:$0xf]  ;;  %1262 = vst.msk [vmem:[%s1739_s19] sm:$0xf] %vm1261_vm11, %v1253_v2 }
 0x211   : > { %v1246_v5 = vadd.f32 %v1245_v3, %v1241_v4  ;;  %1264 = vst.msk [vmem:[%s1739_s19] sm:$0xf] %vm1263_vm12, %v1253_v2 }
 0x212   : > { %1266 = vst.msk [vmem:[%s1739_s19] sm:$0xf] %vm1265_vm13, %v1253_v2 }
 0x213   : > { %1248 = vst.msk [vmem:[%s1884_s9] sm:$0xf] %vm1247_vm14, %v1246_v5 }
 0x214   : > { %1268 = vst.msk [vmem:[%s1739_s19] sm:$0xf] %vm1267_vm15, %v1253_v2 }
 0x215   : > { %1270 = vst.msk [vmem:[%s1739_s19] sm:$0xf] %vm1269_vm0, %v1253_v2 }
 0x216 PF: > { %s20_s5 = sadd.s32 1, %s1612_s5   ;;  %s1890_s10 = sld [smem:[#allocation3_spill]] }
 0x217   : > { %p17_p5 = scmp.ge.s32.totalorder %s20_s5, 18   ;;  %s1891_s14 = sld [smem:[#allocation4_spill]] }
 0x218   : > { %s1892_s12 = sld [smem:[#allocation5_spill]]  ;;  %s1893_s30 = smov %s1604_s11 }
 0x219   :  { %19 = sbr.rel (!%p17_p5) target bundleno = 3 (0x3), region = 108 }
 0x21d   : > { %s1894_s11 = smov %s1891_s14 }

// kernel: conv_res_block_3d.6
= control target key start
LH: loop header
LB: loop body
LE: loop exit
PB: predicated region body
PF: predicated region fallthrough
CT: control target
= control target key end

     0   :  { %s1825_s30 = smov 0   ;;  %s1827_s10 = smov 0   ;;  %s2081_s0 = inlined_call_operand.vmem [shape: f32[2,8,4,100], index: 0, kind: input, shape index: {}, may-alias: {0,1,2}]   ;;  %s2082_s1 = inlined_call_operand.vmem [shape: f32[2,8,4,100], index: 1, kind: input, shape index: {}, may-alias: {0,1,2}]   ;;  %s2083_s2 = inlined_call_operand.vmem [shape: f32[2,8,4,100], index: 2, kind: input, shape index: {}, may-alias: {0,1,2}]   ;;  %s2084_s3 = inlined_call_operand.vmem [shape: f32[9,4,12], index: 3, kind: input, shape index: {}]   ;;  %s2085_s4 = inlined_call_operand.vmem [shape: f32[4,1], index: 4, kind: input, shape index: {}]   ;;  %s2086_s5 = inlined_call_operand.vmem [shape: f32[4,1], index: 5, kind: input, shape index: {}]   ;;  %s2087_s6 = inlined_call_operand.vmem [shape: f32[4,1], index: 6, kind: input, shape index: {}]   ;;  %s2088_s7 = inlined_call_operand.vmem [shape: f32[1,100], index: 7, kind: input, shape index: {}]   ;;  %s2089_s8 = inlined_call_operand.vmem [shape: f32[2,8,4,64], index: 8, kind: output, shape index: {0}]   ;;  %s2090_s9 = inlined_call_operand.vmem [shape: f32[4,2], index: 9, kind: output, shape index: {1}]  }
   0x1   :  { %s1829_s11 = smov 0   ;;  %s1831_s12 = smov 0  }
   0x2   :  { %s1833_s13 = smov 0  }
   0x3 LB: > { %s29_s14 = sadd.s32 1, %s1749_s11  ;;  %s32_s15 = sadd.s32 1, %s1753_s12  ;;  %s1757_s13 = sphi %s1833_s13, %s20_s13   ;;  %s1753_s12 = sphi %s1831_s12, %s2100_s12   ;;  %s1749_s11 = sphi %s1829_s11, %s2099_s11   ;;  %s1745_s10 = sphi %s1827_s10, %s2098_s10   ;;  %s1741_s30 = sphi %s1825_s30, %s2097_s30  }
   0x4   : > { %p30_p0 = scmp.ge.s32.totalorder %s29_s14, 8  ;;  %p1516_p1 = scmp.ge.s32.totalorder %s1757_s13, 1 }
   0x5   : > { %p358_p2 = scmp.lt.s32.totalorder %s1757_s13, 17 }
   0x6   : > { %s2102_s14 = smov (%p30_p0, %s29_s14), 0  ;;  %s2104_s15 = smov (!%p30_p0, %s32_s15), %s1753_s12 }
   0x7   : > { %2091 = sst [smem:[#allocation3_spill]] %s2102_s14  ;;  %p359_p3 = pnand %p1516_p1, %p358_p2 }
   0x8   : > { %p34_p4 = scmp.ge.s32.totalorder %s2104_s15, 2  ;;  %s1860_s16 = sadd.s32 (!%p359_p3), 4294967295, %s1741_s30 }
   0x9   : > { %362 = sbr.rel (%p359_p3) target bundleno = 712 (0x2c8), region = 52  ;;  %p425_p5 = scmp.lt.s32.totalorder (!%p359_p3), %s1745_s10, 1 }
   0xa   : > { %s2106_s15 = smov (%p34_p4, %s2104_s15), 0  ;;  %p423_p6 = scmp.gt.s32.totalorder (!%p359_p3), %s1860_s16, 0 }
   0xb   : > { %2092 = sst [smem:[#allocation4_spill]] %s2106_s15  ;;  %p1518_p7 = scmp.lt.s32.totalorder (!%p359_p3), %s1860_s16, 7 }
   0xc   : > { %p438_p8 = scmp.lt.s32.totalorder (!%p359_p3), %s1741_s30, 7  ;;  %s1870_s22 = sadd.s32 (!%p359_p3), 1, %s1741_s30 }
   0xd   : > { %p445_p9 = scmp.lt.s32.totalorder (!%p359_p3), %s1870_s22, 7  ;;  %p466_p10 = scmp.eq.s32.totalorder (!%p359_p3), %s1745_s10, 0 }
   0xe   : > { %s426_s17 = scalar_select %p425_p5, %s1745_s10, 1 }
   0xf   : > { %s424_s18 = scalar_select %p423_p6, %s1860_s16, 0 }
  0x10   : > { %s1523_s19 = sshll.u32 %s426_s17, 3  ;;  %p467_p11 = scmp.eq.s32.totalorder %s1741_s30, 0 }
  0x11   : > { %s2108_s18 = smov (!%p1518_p7, %s424_s18), 7 }
  0x12   : > { %s439_s20 = scalar_select %p438_p8, %s1741_s30, 7 }
  0x13   : > { %s430_s21 = sadd.s32 %s2108_s18, %s1523_s19  ;;  %p468_p12 = pnand %p467_p11, %p466_p10 }
  0x14   : > { %s1872_s23 = sshll.u32 %s430_s21, 2  ;;  %s441_s24 = sadd.s32 %s1523_s19, %s439_s20 }
  0x15   : > { %s1878_s28 = sshll.u32 %s441_s24, 2 }
  0x16   : > { %s443_s18 = scalar_lea.vmem %s2082_s1, %s1878_s28  ;;  %s1889_s21 = scalar_lea.vmem %s2089_s8, %s1878_s28 }
  0x17   : > { %s446_s20 = scalar_select %p445_p9, %s1870_s22, 7 }
  0x18   : > { %471 = sbr.rel (%p468_p12) target bundleno = 31 (0x1f), region = 56 }
  0x19   : > { %s2110_s20 = smov (!%p445_p9, %s446_s20), 7 }
  0x1a   : > { %s452_s25 = sadd.s32 %s1523_s19, %s2110_s20 }
  0x1b   : > { %s1894_s24 = sshll.u32 %s452_s25, 2 }
  0x1c   : > { %s454_s29 = scalar_lea.vmem %s2083_s2, %s1894_s24 }
  0x1d   : > { %vm472_vm0 = vcmask 11264   ;;  %v1759_v0 = vmov 0.0  }
  0x1e   : > { %473 = vst.msk [vmem:[%s2090_s9] sm:$0xf] %vm472_vm0, %v1759_v0 }
  0x1f PF: > { %v541_v1 = vld [vmem:[%s2087_s6] sm:$0xf]  ;;  %v1760_v3 = vmov 0   ;;  %v1761_v8 = vmov 0.0   ;;  %p558_p13 = scmp.ge.s32.totalorder %s1870_s22, 0  ;;  %p559_p0 = scmp.lt.s32.totalorder %s1870_s22, 8 }
  0x20   : > { %v534_v2 = vld [vmem:[%s2086_s5] sm:$0xf]  ;;  %1718 = vset.pattern.permute.xlu1 %v1760_v3  ;;  %1717 = vset.pattern.permute.xlu0 %v1760_v3  ;;  %p499_p1 = scmp.ge.s32.totalorder %s1860_s16, 0  ;;  %p500_p2 = scmp.lt.s32.totalorder %s1860_s16, 8  ;;  %vm506_vm1 = vcmask 814080   ;;  %vm1762_vm2 = vmmov 0  }
  0x21   : > { %544 = vperm.xlu1 %1718, %v541_v1   ;;  %537 = vperm.xlu0 %1717, %v534_v2   ;;  %v482_v4 = vld [vmem:[%s2087_s6] sm:$0xf]  ;;  %p560_p3 = pnand %p559_p0, %p558_p13  ;;  %s2094_s20 = scalar_lea.vmem %s2081_s0, %s1872_s23  ;;  %vm582_vm3 = vcmask 1043456   ;;  %vm578_vm4 = vcmask 97280   ;;  %v1540_v41 = vld [vmem:[%s2084_s3 + $0x4] sm:$0xf] }
  0x22   : > { %v475_v5 = vld [vmem:[%s2086_s5] sm:$0xf]  ;;  %1605 = vmatprep.subr.mxu1 %v1761_v8  ;;  %1598 = vmatprep.subr.mxu0 %v1761_v8  ;;  %p1927_p4 = pnand %p500_p2, %p499_p1  ;;  %s1763_s23 = smov 127   ;;  %v1545_v44 = vld [vmem:[%s2084_s3 + $0x8] sm:$0xf]  ;;  %vm1344_vm5 = vcmask 60416  }
  0x23   : > { %v516_v6 = vld [vmem:[%s2087_s6] sm:$0xf]  ;;  %s1539_s15 = scalar_select %p560_p3, 0.0, 1.0  ;;  %1602 = vmatprep.mubr.msk.f32.mxu0 %vm1762_vm2, %v1761_v8  ;;  %1609 = vmatprep.mubr.msk.f32.mxu1 %vm1762_vm2, %v1761_v8  ;;  %v1548_v47 = vld [vmem:[%s2084_s3 + $0xc] sm:$0xf] }
  0x24   : > { %v509_v7 = vld [vmem:[%s2086_s5] sm:$0xf]  ;;  %s1764_s28 = smov 126   ;;  %s1765_s17 = smov 118   ;;  %v1551_v50 = vld [vmem:[%s2084_s3 + $0x10] sm:$0xf] }
  0x25   : > { %485 = vperm.xlu1 %1718, %v482_v4   ;;  %478 = vperm.xlu0 %1717, %v475_v5   ;;  %v533_v9 = vld [vmem:[%s454_s29] sm:$0xf]  ;;  %v563_v20 = vstv %s1539_s15  ;;  %s1536_s29 = scalar_select %p1927_p4, 0.0, 1.0  ;;  %v1554_v53 = vld [vmem:[%s2084_s3 + $0x14] sm:$0xf] }
  0x26   : > { %v474_v13 = vld [vmem:[%s2094_s20] sm:$0xf]  ;;  %s1766_s14 = smov 117   ;;  %s1767_s10 = smov 116   ;;  %v1557_v56 = vld [vmem:[%s2084_s3 + $0x18] sm:$0xf] }
  0x27   : > { %v1939_v15 = vld [vmem:[%s2088_s7] ss:$0 sm:$0xff]  ;;  %v504_v28 = vstv %s1536_s29  ;;  %s1768_s30 = smov 108   ;;  %s1769_s15 = smov 107   ;;  %v1560_v59 = vld [vmem:[%s2084_s3 + $0x1c] sm:$0xf] }
  0x28   : > { %v508_v21 = vld [vmem:[%s443_s18] sm:$0xf]  ;;  %s1770_s19 = smov 106   ;;  %s1771_s29 = smov 124   ;;  %vm1329_vm6 = vcmask 633856   ;;  %vm1350_vm7 = vcmask 126016  }
  0x29   : > { %519 = vperm.xlu1 %1718, %v516_v6   ;;  %512 = vperm.xlu0 %1717, %v509_v7   ;;  %v568_v36 = vld [vmem:[%s2084_s3] sm:$0xf]  ;;  %s1772_s25 = smov 120   ;;  %s1773_s24 = smov 122   ;;  %vm1355_vm8 = vcmask 191616   ;;  %vm1360_vm9 = vcmask 257216  }
  0x2a   : > { %v1311_v38 = vld [vmem:[%s2085_s4] sm:$0xf]  ;;  %vm1365_vm10 = vcmask 322816   ;;  %vm1370_vm11 = vcmask 388416   ;;  %vm1334_vm12 = vcmask 3072   ;;  %vm1375_vm13 = vcmask 454016  }
  0x2b   : > { %v1563_v61 = vld [vmem:[%s2084_s3 + $0x20] sm:$0xf]  ;;  %vm1380_vm14 = vcmask 519616   ;;  %vm1342_vm15 = vcmask 11272  }
  0x9c   : > { %v545_v10 = vpop.permute.xlu1 %544  ;;  %v538_v11 = vpop.permute.xlu0 %537 }
  0x9d   : > { %v540_v12 = vmul.f32 %v538_v11, %v533_v9 }
  0x9f   : > { %v547_v14 = vadd.f32 %v545_v10, %v540_v12 }
  0xa0   : > { %v486_v16 = vpop.permute.xlu1 %485  ;;  %v479_v17 = vpop.permute.xlu0 %478 }
  0xa1   : > { %v548_v18 = vmax.f32 %v547_v14, 0.0  ;;  %v481_v19 = vmul.f32 %v479_v17, %v474_v13 }
  0xa3   : > { %v556_v22 = vmul.f32 %v1939_v15, %v548_v18  ;;  %v488_v23 = vadd.f32 %v486_v16, %v481_v19 }
  0xa4   : > { %v513_v24 = vpop.permute.xlu0 %512  ;;  %v520_v29 = vpop.permute.xlu1 %519 }
  0xa5   : > { %v564_v25 = vmul.f32 %v563_v20, %v556_v22  ;;  %v489_v26 = vmax.f32 %v488_v23, 0.0  ;;  %v515_v27 = vmul.f32 %v513_v24, %v508_v21 }
  0xa7   : > { %565 = vst.msk [vmem:[#allocation2 + $0x8] sm:$0xf] %vm506_vm1, %v564_v25  ;;  %v497_v30 = vmul.f32 %v1939_v15, %v489_v26  ;;  %v522_v31 = vadd.f32 %v520_v29, %v515_v27 }
  0xa9   : > { %v505_v32 = vmul.f32 %v504_v28, %v497_v30  ;;  %v523_v33 = vmax.f32 %v522_v31, 0.0 }
  0xab   : > { %507 = vst.msk [vmem:[#allocation2] sm:$0xf] %vm506_vm1, %v505_v32  ;;  %v531_v34 = vmul.f32 %v1939_v15, %v523_v33 }
  0xad   : > { %532 = vst.msk [vmem:[#allocation2 + $0x4] sm:$0xf] %vm506_vm1, %v531_v34 }
  0xae   : > { %v567_v35 = vld [vmem:[#allocation2 + $0x8] sm:$0xf] }
  0xaf   : > { %1606 = vmatpush3.msk.msra.mxu1 %vm582_vm3, %v567_v35  ;;  %575 = vrot.lane.b32.xlu0 %v567_v35, %s1763_s23 }
  0xb0   : > { %1607 = vmatprep.subr.mxu1 %v1761_v8 }
  0xb3   : > { %734 = vrot.lane.b32.xlu0 %v567_v35, %s1764_s28 }
  0xb4   : > { %v566_v37 = vld [vmem:[#allocation2] sm:$0xff] }
  0xb5   : > { %573 = vrot.lane.b32.xlu1 %v566_v37, %s1763_s23  ;;  %1608 = vmatpush3.msra.mxu1 %v566_v37 }
  0xb6   : > { %1619 = vmatprep.subr.mxu1 %v1761_v8  ;;  %1610 = vmatmul.mubr.msk.f32.vlgmr.msra.gmra.mxu1 %vm578_vm4, %v568_v36 }
  0xb7   : > { %817 = vrot.lane.b32.xlu0 %v567_v35, %s1765_s17  ;;  %1623 = vmatprep.mubr.msk.f32.mxu1 %vm1762_vm2, %v1761_v8 }
  0xb9   : > { %732 = vrot.lane.b32.xlu1 %v566_v37, %s1764_s28 }
  0xbb   : > { %900 = vrot.lane.b32.xlu0 %v567_v35, %s1766_s14 }
  0xbd   : > { %815 = vrot.lane.b32.xlu1 %v566_v37, %s1765_s17 }
  0xbf   : > { %983 = vrot.lane.b32.xlu0 %v567_v35, %s1767_s10 }
  0xc1   : > { %898 = vrot.lane.b32.xlu1 %v566_v37, %s1766_s14 }
  0xc3   : > { %1066 = vrot.lane.b32.xlu0 %v567_v35, %s1768_s30 }
  0xc5   : > { %981 = vrot.lane.b32.xlu1 %v566_v37, %s1767_s10 }
  0xc7   : > { %1149 = vrot.lane.b32.xlu0 %v567_v35, %s1769_s15 }
  0xc9   : > { %1064 = vrot.lane.b32.xlu1 %v566_v37, %s1768_s30 }
  0xcb   : > { %1232 = vrot.lane.b32.xlu0 %v567_v35, %s1770_s19 }
  0xcd   : > { %1147 = vrot.lane.b32.xlu1 %v566_v37, %s1769_s15 }
  0xcf   : > { %1314 = vperm.xlu0 %1717, %v1311_v38  }
  0xd1   : > { %1230 = vrot.lane.b32.xlu1 %v566_v37, %s1770_s19  ;;  %v1328_v37 = vld [vmem:[%s2090_s9] sm:$0xf] }
  0xd5   : > { %1324 = vrot.lane.b32.xlu1 %v1939_v15, %s1766_s14 }
 0x121   : > { %v576_v39 = vpop.permute.xlu0 %575 }
 0x122   : > { %1599 = vmatpush3.msk.msra.mxu0 %vm582_vm3, %v576_v39 }
 0x123   : > { %1600 = vmatprep.subr.mxu0 %v1761_v8 }
 0x125   : > { %v735_v40 = vpop.permute.xlu0 %734 }
 0x127   : > { %v574_v42 = vpop.permute.xlu1 %573 }
 0x128   : > { %1601 = vmatpush3.msra.mxu0 %v574_v42 }
 0x129   : > { %v818_v43 = vpop.permute.xlu0 %817  ;;  %1612 = vmatprep.subr.mxu0 %v1761_v8  ;;  %1603 = vmatmul.mubr.msk.f32.vlgmr.msra.gmra.mxu0 %vm578_vm4, %v1540_v41 }
 0x12a   : > { %1613 = vmatpush3.msk.msra.mxu0 %vm582_vm3, %v735_v40  ;;  %1620 = vmatpush3.msk.msra.mxu1 %vm582_vm3, %v818_v43 }
 0x12b   : > { %1614 = vmatprep.subr.mxu0 %v1761_v8  ;;  %v733_v45 = vpop.permute.xlu1 %732  ;;  %1616 = vmatprep.mubr.msk.f32.mxu0 %vm1762_vm2, %v1761_v8 }
 0x12c   : > { %1615 = vmatpush3.msra.mxu0 %v733_v45  ;;  %1621 = vmatprep.subr.mxu1 %v1761_v8 }
 0x12d   : > { %v901_v46 = vpop.permute.xlu0 %900  ;;  %1626 = vmatprep.subr.mxu0 %v1761_v8  ;;  %1617 = vmatmul.mubr.msk.f32.vlgmr.msra.gmra.mxu0 %vm578_vm4, %v1545_v44 }
 0x12e   : > { %1627 = vmatpush3.msk.msra.mxu0 %vm582_vm3, %v901_v46  ;;  %1630 = vmatprep.mubr.msk.f32.mxu0 %vm1762_vm2, %v1761_v8 }
 0x12f   : > { %v816_v48 = vpop.permute.xlu1 %815  ;;  %1628 = vmatprep.subr.mxu0 %v1761_v8 }
 0x130   : > { %1622 = vmatpush3.msra.mxu1 %v816_v48 }
 0x131   : > { %v984_v49 = vpop.permute.xlu0 %983  ;;  %1633 = vmatprep.subr.mxu1 %v1761_v8  ;;  %1624 = vmatmul.mubr.msk.f32.vlgmr.msra.gmra.mxu1 %vm578_vm4, %v1548_v47 }
 0x132   : > { %1634 = vmatpush3.msk.msra.mxu1 %vm582_vm3, %v984_v49  ;;  %1637 = vmatprep.mubr.msk.f32.mxu1 %vm1762_vm2, %v1761_v8 }
 0x133   : > { %v899_v51 = vpop.permute.xlu1 %898  ;;  %1635 = vmatprep.subr.mxu1 %v1761_v8 }
 0x134   : > { %1629 = vmatpush3.msra.mxu0 %v899_v51 }
 0x135   : > { %v1067_v52 = vpop.permute.xlu0 %1066  ;;  %1640 = vmatprep.subr.mxu0 %v1761_v8  ;;  %1631 = vmatmul.mubr.msk.f32.vlgmr.msra.gmra.mxu0 %vm578_vm4, %v1551_v50 }
 0x136   : > { %1641 = vmatpush3.msk.msra.mxu0 %vm582_vm3, %v1067_v52  ;;  %1644 = vmatprep.mubr.msk.f32.mxu0 %vm1762_vm2, %v1761_v8 }
 0x137   : > { %v982_v54 = vpop.permute.xlu1 %981  ;;  %1642 = vmatprep.subr.mxu0 %v1761_v8 }
 0x138   : > { %1636 = vmatpush3.msra.mxu1 %v982_v54 }
 0x139   : > { %v1150_v55 = vpop.permute.xlu0 %1149  ;;  %1647 = vmatprep.subr.mxu1 %v1761_v8  ;;  %1638 = vmatmul.mubr.msk.f32.vlgmr.msra.gmra.mxu1 %vm578_vm4, %v1554_v53 }
 0x13a   : > { %1648 = vmatpush3.msk.msra.mxu1 %vm582_vm3, %v1150_v55  ;;  %1651 = vmatprep.mubr.msk.f32.mxu1 %vm1762_vm2, %v1761_v8 }
 0x13b   : > { %v1065_v57 = vpop.permute.xlu1 %1064  ;;  %1649 = vmatprep.subr.mxu1 %v1761_v8 }
 0x13c   : > { %1643 = vmatpush3.msra.mxu0 %v1065_v57 }
 0x13d   : > { %v1233_v58 = vpop.permute.xlu0 %1232  ;;  %1654 = vmatprep.subr.mxu0 %v1761_v8  ;;  %1645 = vmatmul.mubr.msk.f32.vlgmr.msra.gmra.mxu0 %vm578_vm4, %v1557_v56 }
 0x13e   : > { %1655 = vmatpush3.msk.msra.mxu0 %vm582_vm3, %v1233_v58  ;;  %1658 = vmatprep.mubr.msk.f32.mxu0 %vm1762_vm2, %v1761_v8 }
 0x13f   : > { %v1148_v60 = vpop.permute.xlu1 %1147  ;;  %1656 = vmatprep.subr.mxu0 %v1761_v8 }
 0x140   : > { %1650 = vmatpush3.msra.mxu1 %v1148_v60 }
 0x141   : > { %1652 = vmatmul.mubr.msk.f32.vlgmr.msra.gmra.mxu1 %vm578_vm4, %v1560_v59 }
 0x143   : > { %v1231_v62 = vpop.permute.xlu1 %1230 }
 0x144   : > { %1657 = vmatpush3.msra.mxu0 %v1231_v62 }
 0x145   : > { %1659 = vmatmul.mubr.msk.f32.vlgmr.msra.gmra.mxu0 %vm578_vm4, %v1563_v61 }
 0x147   : > { %v1325_v27 = vpop.permute.xlu1 %1324 }
 0x14a   : > { %v1315_v24 = vpop.permute.xlu0 %1314 }
 0x176   : > { %v726_v63 = vpop.f32.mrf.mxu1 }
 0x178   : > { %v1611_v0 = vpop.f32.mrf.mxu1 }
 0x1e9   : > { %v651_v1 = vpop.f32.mrf.mxu0 }
 0x1ea   : > { %v727_v3 = vadd.f32 %v726_v63, %v651_v1 }
 0x1eb   : > { %v1604_v2 = vpop.f32.mrf.mxu0 }
 0x1ed   : > { %v808_v4 = vpop.f32.mrf.mxu0 }
 0x1ee   : > { %v812_v6 = vadd.f32 %v808_v4, %v727_v3 }
 0x1ef   : > { %v1618_v5 = vpop.f32.mrf.mxu0 }
 0x1f1   : > { %v891_v7 = vpop.f32.mrf.mxu1 }
 0x1f2   : > { %v895_v9 = vadd.f32 %v891_v7, %v812_v6 }
 0x1f3   : > { %v1625_v8 = vpop.f32.mrf.mxu1 }
 0x1f5   : > { %v974_v10 = vpop.f32.mrf.mxu0 }
 0x1f6   : > { %v978_v12 = vadd.f32 %v974_v10, %v895_v9 }
 0x1f7   : > { %v1632_v11 = vpop.f32.mrf.mxu0 }
 0x1f9   : > { %v1057_v13 = vpop.f32.mrf.mxu1 }
 0x1fa   : > { %v1061_v15 = vadd.f32 %v1057_v13, %v978_v12 }
 0x1fb   : > { %v1639_v14 = vpop.f32.mrf.mxu1 }
 0x1fd   : > { %v1140_v16 = vpop.f32.mrf.mxu0 }
 0x1fe   : > { %v1144_v18 = vadd.f32 %v1140_v16, %v1061_v15 }
 0x1ff   : > { %v1646_v17 = vpop.f32.mrf.mxu0 }
 0x201   : > { %v1223_v19 = vpop.f32.mrf.mxu1 }
 0x202   : > { %v1227_v21 = vadd.f32 %v1223_v19, %v1144_v18 }
 0x203   : > { %v1653_v20 = vpop.f32.mrf.mxu1 }
 0x205   : > { %v1306_v22 = vpop.f32.mrf.mxu0 }
 0x206   : > { %v1310_v23 = vadd.f32 %v1306_v22, %v1227_v21 }
 0x207   : > { %v1660_v25 = vpop.f32.mrf.mxu0 }
 0x208   : > { %v1317_v26 = vadd.f32 %v1315_v24, %v1310_v23 }
 0x20a   : > { %1352 = vrot.lane.b32.xlu1 %v1317_v26, %s1771_s29  ;;  %1347 = vrot.lane.b32.xlu0 %v1317_v26, %s1764_s28  ;;  %1345 = vst.msk [vmem:[%s1889_s21] sm:$0xf] %vm1344_vm5, %v1317_v26  ;;  %v1327_v28 = vmul.f32 %v1325_v27, %v1317_v26  ;;  %s1774_s28 = smov 114  }
 0x20c   : > { %v1337_v29 = vmul.f32 %v1327_v28, %v1317_v26  ;;  %v1330_v30 = vsel %vm1329_vm6, %v1327_v28, 0.0 }
 0x20e   : > { %1362 = vrot.lane.b32.xlu1 %v1317_v26, %s1772_s25  ;;  %1357 = vrot.lane.b32.xlu0 %v1317_v26, %s1773_s24  ;;  %v1338_v31 = vsel %vm1329_vm6, %v1337_v29, 0.0 }
 0x212   : > { %1367 = vrot.lane.b32.xlu0 %v1317_v26, %s1765_s17 }
 0x231   : > { %1331 = vadd.xlane.f32.xlu0 %v1330_v30 }
 0x232   : > { %1339 = vadd.xlane.f32.xlu1 %v1338_v31 }
 0x243   : > { %1372 = vrot.lane.b32.xlu1 %v1317_v26, %s1767_s10 }
 0x247   : > { %1377 = vrot.lane.b32.xlu0 %v1317_v26, %s1774_s28 }
 0x27c   : > { %v1353_v32 = vpop.permute.xlu1 %1352  ;;  %v1348_v33 = vpop.permute.xlu0 %1347 }
 0x27d   : > { %1351 = vst.msk [vmem:[%s1889_s21] sm:$0xf] %vm1350_vm7, %v1348_v33 }
 0x27e   : > { %1356 = vst.msk [vmem:[%s1889_s21] sm:$0xf] %vm1355_vm8, %v1353_v32 }
 0x280   : > { %v1363_v34 = vpop.permute.xlu1 %1362  ;;  %v1358_v35 = vpop.permute.xlu0 %1357 }
 0x281   : > { %1361 = vst.msk [vmem:[%s1889_s21] sm:$0xf] %vm1360_vm9, %v1358_v35 }
 0x282   : > { %1366 = vst.msk [vmem:[%s1889_s21] sm:$0xf] %vm1365_vm10, %v1363_v34 }
 0x284   : > { %v1368_v36 = vpop.permute.xlu0 %1367 }
 0x285   : > { %1371 = vst.msk [vmem:[%s1889_s21] sm:$0xf] %vm1370_vm11, %v1368_v36 }
 0x2ba   : > { %v1332_v38 = vpop.xlane.xlu0 %1331 }
 0x2bb   : > { %v1333_v39 = vadd.f32 %v1332_v38, %v1328_v37  ;;  %v1340_v40 = vpop.xlane.xlu1 %1339 }
 0x2bd   : > { %1335 = vst.msk [vmem:[%s2090_s9] sm:$0xf] %vm1334_vm12, %v1333_v39 }
 0x2be   : > { %v1378_v42 = vpop.permute.xlu0 %1377 }
 0x2bf   : > { %v1373_v41 = vpop.permute.xlu1 %1372 }
 0x2c0   : > { %1376 = vst.msk [vmem:[%s1889_s21] sm:$0xf] %vm1375_vm13, %v1373_v41 }
 0x2c1   : > { %1381 = vst.msk [vmem:[%s1889_s21] sm:$0xf] %vm1380_vm14, %v1378_v42 }
 0x2c4   : > { %v1336_v43 = vld [vmem:[%s2090_s9] sm:$0xf] }
 0x2c5   : > { %v1341_v44 = vadd.f32 %v1340_v40, %v1336_v43 }
 0x2c7   : > { %1343 = vst.msk [vmem:[%s2090_s9] sm:$0xf] %vm1342_vm15, %v1341_v44 }
 0x2c8 PF: > { %s20_s13 = sadd.s32 1, %s1757_s13   ;;  %s2095_s19 = sld [smem:[#allocation3_spill]] }
 0x2c9   : > { %p17_p5 = scmp.ge.s32.totalorder %s20_s13, 18   ;;  %s2096_s27 = sld [smem:[#allocation4_spill]] }
 0x2ca   : > { %s2097_s30 = smov %s1749_s11  ;;  %s2098_s10 = smov %s1753_s12 }
 0x2cb   :  { %19 = sbr.rel (!%p17_p5) target bundleno = 3 (0x3), region = 108 }
 0x2ce   : > { %s2099_s11 = smov %s2095_s19 }
 0x2cf   : > { %s2100_s12 = smov %s2096_s27 }

</bundles_post_ra>
